<compile_context>
chip_gen: v6e
topology: v6e:2x2x1
jax: 0.10.0
libtpu: 0.0.40
codegen_flags: <defaults>
</compile_context>

<pallas_src>
import functools

import jax
import jax.numpy as jnp
from jax.experimental import pallas as pl
from jax.experimental.pallas import tpu as pltpu


# ---------------------------------------------------------------------------
# Model configuration (small shapes consistent with the module's constructor).
# ---------------------------------------------------------------------------
TEXT_LENGTH = 16          # text_length
VOCAB_SIZE = 32           # vocab_size
N_CLASSES = 8             # n_classes
EMBEDDING_DIM = 16        # embedding_dim
OUT_CHANNELS = (16, 16, 16)
KERNEL_SIZES = (3, 4, 5)
N_FEATURES = 16           # n_features
LINEAR_SIZE = sum(OUT_CHANNELS)

BATCH = 16


# ---------------------------------------------------------------------------
# Pallas kernel (one invocation handles the whole batch).
# ---------------------------------------------------------------------------
def _ccsaa_kernel(sids_ref, table_ref, wcat_ref, bcat_ref, mask_ref,
                  lw1_ref, lb1_ref, lw2_ref, lb2_ref,
                  out_ref,
                  *, batch, text_len, emb_dim, k_max, c_total):
    rows = batch * text_len
    vocab = table_ref.shape[0]

    sids = sids_ref[...]                                            # (rows, k_max) int32
    lane_v = jax.lax.broadcasted_iota(jnp.int32, (rows, vocab), 1)  # (rows, V)
    table = table_ref[...]                                          # (V, E)

    # ---- Fused embedding + conv: for each offset dt, fold the embedding table into
    # the conv weight (MXU, tiny) and apply it to the one-hot of the shifted ids.
    # Pad id (-1) -> all-zero one-hot -> zero contribution, exactly like a zero
    # embedding row past the end of the text.
    acc = None
    for dt in range(k_max):                                         # static unrolled
        w_dt = wcat_ref[dt * emb_dim:(dt + 1) * emb_dim, :]         # (E, c_total)
        wv_dt = jnp.dot(table, w_dt,
                        preferred_element_type=jnp.float32)         # (V, c_total)
        onehot = (sids[:, dt:dt + 1] == lane_v).astype(jnp.float32)  # (rows, V)
        y = jnp.dot(onehot, wv_dt,
                    preferred_element_type=jnp.float32)             # (rows, c_total)
        acc = y if acc is None else acc + y

    acc3 = acc.reshape(batch, text_len, c_total)                    # tile-aligned split
    acc3 = jnp.maximum(acc3 + bcat_ref[...], 0.0)                   # bias + ReLU
    acc3 = acc3 * mask_ref[...]                                     # zero invalid positions
    feat = jnp.max(acc3, axis=1)                                    # MaxPool over time -> (B, c_total)

    # TODO(synk): nn.Dropout() is identity at inference; training-mode stochastic
    # dropout is not reproduced here.

    # ---- Linear -> ReLU ----
    h = jnp.dot(feat, lw1_ref[...], preferred_element_type=jnp.float32) + lb1_ref[...]
    h = jnp.maximum(h, 0.0)

    # ---- F.normalize(p=2, dim=1): x / max(||x||_2, 1e-12) via rsqrt (EUP) ----
    ss = jnp.sum(h * h, axis=1, keepdims=True)
    hn = h * jax.lax.rsqrt(jnp.maximum(ss, 1e-24))

    # ---- Final Linear ----
    out = jnp.dot(hn, lw2_ref[...], preferred_element_type=jnp.float32) + lb2_ref[...]
    out_ref[...] = out.astype(out_ref.dtype)


def ccsaa_forward(x, emb_table, params):
    """x: (B, T) int32 token ids.  emb_table: (V, E) float32.  Returns (B, n_classes)."""
    (w1, b1, w2, b2, w3, b3, lw1, lb1, lw2, lb2) = params
    B, T = x.shape
    V, E = emb_table.shape
    k_max = max(KERNEL_SIZES)
    c_total = sum(OUT_CHANNELS)

    # Shifted ids: sids[b, t, dt] = x[b, t+dt] if t+dt < T else -1 (-> zero one-hot).
    xi = x.astype(jnp.int32)
    x_padded = jnp.concatenate(
        [xi, jnp.full((B, k_max - 1), -1, jnp.int32)], axis=1)       # (B, T + k_max - 1)
    sids = jnp.stack([x_padded[:, dt:dt + T] for dt in range(k_max)], axis=2)
    sids2d = sids.reshape(B * T, k_max)                              # (B*T, k_max)

    # Fused conv weight (k_max*E, c_total): zero-padded where dt >= k_i.
    wcat = jnp.zeros((k_max * E, c_total), jnp.float32)
    col = 0
    for w, k, c in zip((w1, w2, w3), KERNEL_SIZES, OUT_CHANNELS):
        wcat = wcat.at[:k * E, col:col + c].set(w)
        col += c
    bcat = jnp.concatenate([b1, b2, b3], axis=1)                     # (1, c_total)

    # Valid-position mask (T, c_total): position t valid for branch i iff t <= T - k_i.
    t_idx = jnp.arange(T, dtype=jnp.int32)[:, None]
    limits = jnp.concatenate(
        [jnp.full((c,), T - k, jnp.int32) for k, c in zip(KERNEL_SIZES, OUT_CHANNELS)]
    )[None, :]
    mask = (t_idx <= limits).astype(jnp.float32)

    kernel = functools.partial(
        _ccsaa_kernel, batch=B, text_len=T,
        emb_dim=E, k_max=k_max, c_total=c_total)

    def full_spec(arr):
        n = arr.ndim
        return pl.BlockSpec(arr.shape, lambda i, _n=n: (0,) * _n)

    inputs = (sids2d, emb_table, wcat, bcat, mask, lw1, lb1, lw2, lb2)

    return pl.pallas_call(
        kernel,
        out_shape=jax.ShapeDtypeStruct((B, N_CLASSES), jnp.float32),
        grid=(1,),
        in_specs=[full_spec(a) for a in inputs],
        out_specs=pl.BlockSpec((B, N_CLASSES), lambda i: (0, 0)),
        compiler_params=pltpu.CompilerParams(
            dimension_semantics=("arbitrary",)),
    )(*inputs)


# ---------------------------------------------------------------------------
# Deterministic parameter init + plain-JAX reference for sanity checking.
# ---------------------------------------------------------------------------
def init_params(key):
    ks = jax.random.split(key, 12)
    emb_table = jax.random.normal(ks[0], (VOCAB_SIZE, EMBEDDING_DIM), jnp.float32) * 0.1

    def conv_w(k, kern, c_out):
        # PyTorch weight layout (C_out, 1, kern, E) -> reshape to (kern*E, C_out)
        w = jax.random.normal(k, (c_out, 1, kern, EMBEDDING_DIM), jnp.float32) * 0.05
        return jnp.transpose(w.reshape(c_out, kern * EMBEDDING_DIM), (1, 0))

    w1 = conv_w(ks[1], KERNEL_SIZES[0], OUT_CHANNELS[0])
    b1 = jax.random.normal(ks[2], (1, OUT_CHANNELS[0]), jnp.float32) * 0.01
    w2 = conv_w(ks[3], KERNEL_SIZES[1], OUT_CHANNELS[1])
    b2 = jax.random.normal(ks[4], (1, OUT_CHANNELS[1]), jnp.float32) * 0.01
    w3 = conv_w(ks[5], KERNEL_SIZES[2], OUT_CHANNELS[2])
    b3 = jax.random.normal(ks[6], (1, OUT_CHANNELS[2]), jnp.float32) * 0.01

    lw1 = jax.random.normal(ks[7], (LINEAR_SIZE, N_FEATURES), jnp.float32) * 0.05
    lb1 = jax.random.normal(ks[8], (1, N_FEATURES), jnp.float32) * 0.01
    lw2 = jax.random.normal(ks[9], (N_FEATURES, N_CLASSES), jnp.float32) * 0.05
    lb2 = jax.random.normal(ks[10], (1, N_CLASSES), jnp.float32) * 0.01
    return emb_table, (w1, b1, w2, b2, w3, b3, lw1, lb1, lw2, lb2)


def reference_forward(x, emb_table, params):
    (w1, b1, w2, b2, w3, b3, lw1, lb1, lw2, lb2) = params
    embeds = jnp.take(emb_table, x, axis=0)                 # (B, T, E)
    B, T, E = embeds.shape

    def branch(w, b, k):
        L = T - k + 1
        windows = jnp.stack([embeds[:, t:t + k, :].reshape(B, k * E)
                             for t in range(L)], axis=1)    # (B, L, k*E)
        y = jnp.einsum('blf,fc->blc', windows, w) + b[None]
        y = jnp.maximum(y, 0.0)
        return jnp.max(y, axis=1)

    feat = jnp.concatenate([branch(w1, b1, KERNEL_SIZES[0]),
                            branch(w2, b2, KERNEL_SIZES[1]),
                            branch(w3, b3, KERNEL_SIZES[2])], axis=1)
    h = jnp.maximum(feat @ lw1 + lb1, 0.0)
    hn = h / jnp.maximum(jnp.sqrt(jnp.sum(h * h, axis=1, keepdims=True)), 1e-12)
    return hn @ lw2 + lb2


if __name__ == "__main__":
    key = jax.random.PRNGKey(0)
    k_param, k_data = jax.random.split(key)

    emb_table, params = init_params(k_param)

    # Token ids, PyTorch input x: (B, text_length) int
    x = jax.random.randint(k_data, (BATCH, TEXT_LENGTH), 0, VOCAB_SIZE, dtype=jnp.int32)

    fwd = jax.jit(ccsaa_forward)
    out = jax.block_until_ready(fwd(x, emb_table, params))

    ref = reference_forward(x, emb_table, params)
    assert out.shape == (BATCH, N_CLASSES)
    assert jnp.allclose(out, ref, rtol=2e-2, atol=2e-2), "mismatch vs reference"

    print("KERNEL_OK")
</pallas_src>

<mosaic_0001>
module attributes {stable_mosaic.version = 11 : i64} {
  func.func @_ccsaa_kernel(%arg0: i32, %arg1: memref<256x5xi32, #tpu.memory_space<vmem>>, %arg2: memref<32x16xf32, #tpu.memory_space<vmem>>, %arg3: memref<80x48xf32, #tpu.memory_space<vmem>>, %arg4: memref<1x48xf32, #tpu.memory_space<vmem>>, %arg5: memref<16x48xf32, #tpu.memory_space<vmem>>, %arg6: memref<48x16xf32, #tpu.memory_space<vmem>>, %arg7: memref<1x16xf32, #tpu.memory_space<vmem>>, %arg8: memref<16x8xf32, #tpu.memory_space<vmem>>, %arg9: memref<1x8xf32, #tpu.memory_space<vmem>>, %arg10: memref<16x8xf32, #tpu.memory_space<vmem>>) attributes {dimension_semantics = [#tpu.dimension_semantics<arbitrary>], iteration_bounds = array<i64: 1>, scalar_prefetch = 0 : i64, scratch_operands = 0 : i64, tpu.core_type = #tpu.core_type<tc>, window_params = [{pipeline_mode = #tpu.pipeline_mode<synchronous>, transform_indices = @transform_0, window_bounds = array<i64: 256, 5>}, {pipeline_mode = #tpu.pipeline_mode<synchronous>, transform_indices = @transform_1, window_bounds = array<i64: 32, 16>}, {pipeline_mode = #tpu.pipeline_mode<synchronous>, transform_indices = @transform_2, window_bounds = array<i64: 80, 48>}, {pipeline_mode = #tpu.pipeline_mode<synchronous>, transform_indices = @transform_3, window_bounds = array<i64: 1, 48>}, {pipeline_mode = #tpu.pipeline_mode<synchronous>, transform_indices = @transform_4, window_bounds = array<i64: 16, 48>}, {pipeline_mode = #tpu.pipeline_mode<synchronous>, transform_indices = @transform_5, window_bounds = array<i64: 48, 16>}, {pipeline_mode = #tpu.pipeline_mode<synchronous>, transform_indices = @transform_6, window_bounds = array<i64: 1, 16>}, {pipeline_mode = #tpu.pipeline_mode<synchronous>, transform_indices = @transform_7, window_bounds = array<i64: 16, 8>}, {pipeline_mode = #tpu.pipeline_mode<synchronous>, transform_indices = @transform_8, window_bounds = array<i64: 1, 8>}, {pipeline_mode = #tpu.pipeline_mode<synchronous>, transform_indices = @transform_9, window_bounds = array<i64: 16, 8>}]} {
    %c0 = arith.constant 0 : index
    %c0_0 = arith.constant 0 : index
    %0 = vector.load %arg1[%c0, %c0_0] : memref<256x5xi32, #tpu.memory_space<vmem>>, vector<256x5xi32>
    %1 = tpu.iota {dimensions = array<i32: 1>} : vector<256x32xi32>
    %c0_1 = arith.constant 0 : index
    %c0_2 = arith.constant 0 : index
    %2 = vector.load %arg2[%c0_1, %c0_2] : memref<32x16xf32, #tpu.memory_space<vmem>>, vector<32x16xf32>
    %c0_3 = arith.constant 0 : index
    %c0_4 = arith.constant 0 : index
    %3 = vector.load %arg3[%c0_3, %c0_4] : memref<80x48xf32, #tpu.memory_space<vmem>>, vector<16x48xf32>
    %cst = arith.constant dense<0.000000e+00> : vector<32x48xf32>
    %4 = tpu.matmul %2, %3, %cst {dimension_numbers = #tpu.dot_dimension_numbers<[1], [0], [0], [1], [0, 0, 1, 1], [], []>} : vector<32x16xf32>, vector<16x48xf32>, vector<32x48xf32> -> vector<32x48xf32>
    %5 = vector.extract_strided_slice %0 {offsets = [0, 0], sizes = [256, 1], strides = [1, 1]} : vector<256x5xi32> to vector<256x1xi32>
    %6 = vector.broadcast %5 : vector<256x1xi32> to vector<256x32xi32>
    %7 = arith.cmpi eq, %6, %1 : vector<256x32xi32>
    %8 = arith.extui %7 : vector<256x32xi1> to vector<256x32xi32>
    %9 = arith.sitofp %8 : vector<256x32xi32> to vector<256x32xf32>
    %cst_5 = arith.constant dense<0.000000e+00> : vector<256x48xf32>
    %10 = tpu.matmul %9, %4, %cst_5 {dimension_numbers = #tpu.dot_dimension_numbers<[1], [0], [0], [1], [0, 0, 1, 1], [], []>} : vector<256x32xf32>, vector<32x48xf32>, vector<256x48xf32> -> vector<256x48xf32>
    %c16 = arith.constant 16 : index
    %c0_6 = arith.constant 0 : index
    %11 = vector.load %arg3[%c16, %c0_6] : memref<80x48xf32, #tpu.memory_space<vmem>>, vector<16x48xf32>
    %cst_7 = arith.constant dense<0.000000e+00> : vector<32x48xf32>
    %12 = tpu.matmul %2, %11, %cst_7 {dimension_numbers = #tpu.dot_dimension_numbers<[1], [0], [0], [1], [0, 0, 1, 1], [], []>} : vector<32x16xf32>, vector<16x48xf32>, vector<32x48xf32> -> vector<32x48xf32>
    %13 = vector.extract_strided_slice %0 {offsets = [0, 1], sizes = [256, 1], strides = [1, 1]} : vector<256x5xi32> to vector<256x1xi32>
    %14 = vector.broadcast %13 : vector<256x1xi32> to vector<256x32xi32>
    %15 = arith.cmpi eq, %14, %1 : vector<256x32xi32>
    %16 = arith.extui %15 : vector<256x32xi1> to vector<256x32xi32>
    %17 = arith.sitofp %16 : vector<256x32xi32> to vector<256x32xf32>
    %cst_8 = arith.constant dense<0.000000e+00> : vector<256x48xf32>
    %18 = tpu.matmul %17, %12, %cst_8 {dimension_numbers = #tpu.dot_dimension_numbers<[1], [0], [0], [1], [0, 0, 1, 1], [], []>} : vector<256x32xf32>, vector<32x48xf32>, vector<256x48xf32> -> vector<256x48xf32>
    %19 = arith.addf %10, %18 : vector<256x48xf32>
    %c32 = arith.constant 32 : index
    %c0_9 = arith.constant 0 : index
    %20 = vector.load %arg3[%c32, %c0_9] : memref<80x48xf32, #tpu.memory_space<vmem>>, vector<16x48xf32>
    %cst_10 = arith.constant dense<0.000000e+00> : vector<32x48xf32>
    %21 = tpu.matmul %2, %20, %cst_10 {dimension_numbers = #tpu.dot_dimension_numbers<[1], [0], [0], [1], [0, 0, 1, 1], [], []>} : vector<32x16xf32>, vector<16x48xf32>, vector<32x48xf32> -> vector<32x48xf32>
    %22 = vector.extract_strided_slice %0 {offsets = [0, 2], sizes = [256, 1], strides = [1, 1]} : vector<256x5xi32> to vector<256x1xi32>
    %23 = vector.broadcast %22 : vector<256x1xi32> to vector<256x32xi32>
    %24 = arith.cmpi eq, %23, %1 : vector<256x32xi32>
    %25 = arith.extui %24 : vector<256x32xi1> to vector<256x32xi32>
    %26 = arith.sitofp %25 : vector<256x32xi32> to vector<256x32xf32>
    %cst_11 = arith.constant dense<0.000000e+00> : vector<256x48xf32>
    %27 = tpu.matmul %26, %21, %cst_11 {dimension_numbers = #tpu.dot_dimension_numbers<[1], [0], [0], [1], [0, 0, 1, 1], [], []>} : vector<256x32xf32>, vector<32x48xf32>, vector<256x48xf32> -> vector<256x48xf32>
    %28 = arith.addf %19, %27 : vector<256x48xf32>
    %c48 = arith.constant 48 : index
    %c0_12 = arith.constant 0 : index
    %29 = vector.load %arg3[%c48, %c0_12] : memref<80x48xf32, #tpu.memory_space<vmem>>, vector<16x48xf32>
    %cst_13 = arith.constant dense<0.000000e+00> : vector<32x48xf32>
    %30 = tpu.matmul %2, %29, %cst_13 {dimension_numbers = #tpu.dot_dimension_numbers<[1], [0], [0], [1], [0, 0, 1, 1], [], []>} : vector<32x16xf32>, vector<16x48xf32>, vector<32x48xf32> -> vector<32x48xf32>
    %31 = vector.extract_strided_slice %0 {offsets = [0, 3], sizes = [256, 1], strides = [1, 1]} : vector<256x5xi32> to vector<256x1xi32>
    %32 = vector.broadcast %31 : vector<256x1xi32> to vector<256x32xi32>
    %33 = arith.cmpi eq, %32, %1 : vector<256x32xi32>
    %34 = arith.extui %33 : vector<256x32xi1> to vector<256x32xi32>
    %35 = arith.sitofp %34 : vector<256x32xi32> to vector<256x32xf32>
    %cst_14 = arith.constant dense<0.000000e+00> : vector<256x48xf32>
    %36 = tpu.matmul %35, %30, %cst_14 {dimension_numbers = #tpu.dot_dimension_numbers<[1], [0], [0], [1], [0, 0, 1, 1], [], []>} : vector<256x32xf32>, vector<32x48xf32>, vector<256x48xf32> -> vector<256x48xf32>
    %37 = arith.addf %28, %36 : vector<256x48xf32>
    %c64 = arith.constant 64 : index
    %c0_15 = arith.constant 0 : index
    %38 = vector.load %arg3[%c64, %c0_15] : memref<80x48xf32, #tpu.memory_space<vmem>>, vector<16x48xf32>
    %cst_16 = arith.constant dense<0.000000e+00> : vector<32x48xf32>
    %39 = tpu.matmul %2, %38, %cst_16 {dimension_numbers = #tpu.dot_dimension_numbers<[1], [0], [0], [1], [0, 0, 1, 1], [], []>} : vector<32x16xf32>, vector<16x48xf32>, vector<32x48xf32> -> vector<32x48xf32>
    %40 = vector.extract_strided_slice %0 {offsets = [0, 4], sizes = [256, 1], strides = [1, 1]} : vector<256x5xi32> to vector<256x1xi32>
    %41 = vector.broadcast %40 : vector<256x1xi32> to vector<256x32xi32>
    %42 = arith.cmpi eq, %41, %1 : vector<256x32xi32>
    %43 = arith.extui %42 : vector<256x32xi1> to vector<256x32xi32>
    %44 = arith.sitofp %43 : vector<256x32xi32> to vector<256x32xf32>
    %cst_17 = arith.constant dense<0.000000e+00> : vector<256x48xf32>
    %45 = tpu.matmul %44, %39, %cst_17 {dimension_numbers = #tpu.dot_dimension_numbers<[1], [0], [0], [1], [0, 0, 1, 1], [], []>} : vector<256x32xf32>, vector<32x48xf32>, vector<256x48xf32> -> vector<256x48xf32>
    %46 = arith.addf %37, %45 : vector<256x48xf32>
    %47 = vector.shape_cast %46 : vector<256x48xf32> to vector<16x16x48xf32>
    %c0_18 = arith.constant 0 : index
    %c0_19 = arith.constant 0 : index
    %48 = vector.load %arg4[%c0_18, %c0_19] : memref<1x48xf32, #tpu.memory_space<vmem>>, vector<1x48xf32>
    %49 = vector.shape_cast %48 : vector<1x48xf32> to vector<1x1x48xf32>
    %50 = vector.broadcast %49 : vector<1x1x48xf32> to vector<16x16x48xf32>
    %51 = arith.addf %47, %50 : vector<16x16x48xf32>
    %cst_20 = arith.constant 0.000000e+00 : f32
    %52 = vector.broadcast %cst_20 : f32 to vector<16x16x48xf32>
    %53 = arith.maximumf %51, %52 : vector<16x16x48xf32>
    %c0_21 = arith.constant 0 : index
    %c0_22 = arith.constant 0 : index
    %54 = vector.load %arg5[%c0_21, %c0_22] : memref<16x48xf32, #tpu.memory_space<vmem>>, vector<16x48xf32>
    %55 = vector.shape_cast %54 : vector<16x48xf32> to vector<1x16x48xf32>
    %56 = vector.broadcast %55 : vector<1x16x48xf32> to vector<16x16x48xf32>
    %57 = arith.mulf %53, %56 : vector<16x16x48xf32>
    %cst_23 = arith.constant dense<0xFF800000> : vector<16x48xf32>
    %58 = vector.multi_reduction <maximumf>, %57, %cst_23 [1] : vector<16x16x48xf32> to vector<16x48xf32>
    %c0_24 = arith.constant 0 : index
    %c0_25 = arith.constant 0 : index
    %59 = vector.load %arg6[%c0_24, %c0_25] : memref<48x16xf32, #tpu.memory_space<vmem>>, vector<48x16xf32>
    %cst_26 = arith.constant dense<0.000000e+00> : vector<16x16xf32>
    %60 = tpu.matmul %58, %59, %cst_26 {dimension_numbers = #tpu.dot_dimension_numbers<[1], [0], [0], [1], [0, 0, 1, 1], [], []>} : vector<16x48xf32>, vector<48x16xf32>, vector<16x16xf32> -> vector<16x16xf32>
    %c0_27 = arith.constant 0 : index
    %c0_28 = arith.constant 0 : index
    %61 = vector.load %arg7[%c0_27, %c0_28] : memref<1x16xf32, #tpu.memory_space<vmem>>, vector<1x16xf32>
    %62 = vector.broadcast %61 : vector<1x16xf32> to vector<16x16xf32>
    %63 = arith.addf %60, %62 : vector<16x16xf32>
    %cst_29 = arith.constant 0.000000e+00 : f32
    %64 = vector.broadcast %cst_29 : f32 to vector<16x16xf32>
    %65 = arith.maximumf %63, %64 : vector<16x16xf32>
    %66 = arith.mulf %65, %65 : vector<16x16xf32>
    %cst_30 = arith.constant dense<0.000000e+00> : vector<16xf32>
    %67 = vector.multi_reduction <add>, %66, %cst_30 [1] : vector<16x16xf32> to vector<16xf32>
    %68 = vector.shape_cast %67 : vector<16xf32> to vector<16x1xf32>
    %cst_31 = arith.constant 1.000000e-24 : f32
    %69 = vector.broadcast %cst_31 : f32 to vector<16x1xf32>
    %70 = arith.maximumf %68, %69 : vector<16x1xf32>
    %71 = math.rsqrt %70 : vector<16x1xf32>
    %72 = vector.broadcast %71 : vector<16x1xf32> to vector<16x16xf32>
    %73 = arith.mulf %65, %72 : vector<16x16xf32>
    %c0_32 = arith.constant 0 : index
    %c0_33 = arith.constant 0 : index
    %74 = vector.load %arg8[%c0_32, %c0_33] : memref<16x8xf32, #tpu.memory_space<vmem>>, vector<16x8xf32>
    %cst_34 = arith.constant dense<0.000000e+00> : vector<16x8xf32>
    %75 = tpu.matmul %73, %74, %cst_34 {dimension_numbers = #tpu.dot_dimension_numbers<[1], [0], [0], [1], [0, 0, 1, 1], [], []>} : vector<16x16xf32>, vector<16x8xf32>, vector<16x8xf32> -> vector<16x8xf32>
    %c0_35 = arith.constant 0 : index
    %c0_36 = arith.constant 0 : index
    %76 = vector.load %arg9[%c0_35, %c0_36] : memref<1x8xf32, #tpu.memory_space<vmem>>, vector<1x8xf32>
    %77 = vector.broadcast %76 : vector<1x8xf32> to vector<16x8xf32>
    %78 = arith.addf %75, %77 : vector<16x8xf32>
    %c0_37 = arith.constant 0 : index
    %c0_38 = arith.constant 0 : index
    %79 = vector.load %arg10[%c0_37, %c0_38] : memref<16x8xf32, #tpu.memory_space<vmem>>, vector<16x8xf32>
    tpu.vector_store %arg10[%c0_37, %c0_38], %78 {strides = array<i32>} : memref<16x8xf32, #tpu.memory_space<vmem>>, vector<16x8xf32>,
    return
  }
  func.func @transform_0(%arg0: i32) -> (i32, i32) {
    %c0_i32 = arith.constant 0 : i32
    %c0_i32_0 = arith.constant 0 : i32
    %c0_i32_1 = arith.constant 0 : i32
    return %c0_i32, %c0_i32_0 : i32, i32
  }
  func.func @transform_1(%arg0: i32) -> (i32, i32) {
    %c0_i32 = arith.constant 0 : i32
    %c0_i32_0 = arith.constant 0 : i32
    %c0_i32_1 = arith.constant 0 : i32
    return %c0_i32, %c0_i32_0 : i32, i32
  }
  func.func @transform_2(%arg0: i32) -> (i32, i32) {
    %c0_i32 = arith.constant 0 : i32
    %c0_i32_0 = arith.constant 0 : i32
    %c0_i32_1 = arith.constant 0 : i32
    return %c0_i32, %c0_i32_0 : i32, i32
  }
  func.func @transform_3(%arg0: i32) -> (i32, i32) {
    %c0_i32 = arith.constant 0 : i32
    %c0_i32_0 = arith.constant 0 : i32
    %c0_i32_1 = arith.constant 0 : i32
    return %c0_i32, %c0_i32_0 : i32, i32
  }
  func.func @transform_4(%arg0: i32) -> (i32, i32) {
    %c0_i32 = arith.constant 0 : i32
    %c0_i32_0 = arith.constant 0 : i32
    %c0_i32_1 = arith.constant 0 : i32
    return %c0_i32, %c0_i32_0 : i32, i32
  }
  func.func @transform_5(%arg0: i32) -> (i32, i32) {
    %c0_i32 = arith.constant 0 : i32
    %c0_i32_0 = arith.constant 0 : i32
    %c0_i32_1 = arith.constant 0 : i32
    return %c0_i32, %c0_i32_0 : i32, i32
  }
  func.func @transform_6(%arg0: i32) -> (i32, i32) {
    %c0_i32 = arith.constant 0 : i32
    %c0_i32_0 = arith.constant 0 : i32
    %c0_i32_1 = arith.constant 0 : i32
    return %c0_i32, %c0_i32_0 : i32, i32
  }
  func.func @transform_7(%arg0: i32) -> (i32, i32) {
    %c0_i32 = arith.constant 0 : i32
    %c0_i32_0 = arith.constant 0 : i32
    %c0_i32_1 = arith.constant 0 : i32
    return %c0_i32, %c0_i32_0 : i32, i32
  }
  func.func @transform_8(%arg0: i32) -> (i32, i32) {
    %c0_i32 = arith.constant 0 : i32
    %c0_i32_0 = arith.constant 0 : i32
    %c0_i32_1 = arith.constant 0 : i32
    return %c0_i32, %c0_i32_0 : i32, i32
  }
  func.func @transform_9(%arg0: i32) -> (i32, i32) {
    %c0_i32 = arith.constant 0 : i32
    %c0_i32_0 = arith.constant 0 : i32
    %c0_i32_1 = arith.constant 0 : i32
    return %c0_i32, %c0_i32_0 : i32, i32
  }
}

</mosaic_0001>

<bundles_post_ra>
// kernel: ccsaa_forward.1
= control target key start
LH: loop header
LB: loop body
LE: loop exit
PB: predicated region body
PF: predicated region fallthrough
CT: control target
= control target key end

     0   :  { %vm72_vm0 = vcmask 130048   ;;  %v4664_v3 = vmov 1   ;;  %v4665_v41 = vmov 0   ;;  %v64_v42 = vlaneseq  ;;  %s6510_s2 = inlined_call_operand.vmem [shape: f32[80,48], index: 2, kind: input, shape index: {}]   ;;  %s6511_s1 = inlined_call_operand.vmem [shape: f32[32,16], index: 1, kind: input, shape index: {}]   ;;  %s6512_s0 = inlined_call_operand.vmem [shape: s32[256,5], index: 0, kind: input, shape index: {}]   ;;  %s6513_s5 = inlined_call_operand.vmem [shape: f32[48,16], index: 5, kind: input, shape index: {}]   ;;  %s6514_s3 = inlined_call_operand.vmem [shape: f32[1,48], index: 3, kind: input, shape index: {}]   ;;  %s6515_s4 = inlined_call_operand.vmem [shape: f32[16,48], index: 4, kind: input, shape index: {}]   ;;  %s6516_s6 = inlined_call_operand.vmem [shape: f32[1,16], index: 6, kind: input, shape index: {}]   ;;  %s6517_s7 = inlined_call_operand.vmem [shape: f32[16,8], index: 7, kind: input, shape index: {}]   ;;  %s6518_s8 = inlined_call_operand.vmem [shape: f32[1,8], index: 8, kind: input, shape index: {}]   ;;  %s6519_s9 = inlined_call_operand.vmem [shape: f32[16,8], index: 9, kind: output, shape index: {}]  }
   0x1   :  { %v363_v0 = vld [vmem:[%s6510_s2 + $0x18] sm:$0xff]  ;;  %v362_v1 = vld [vmem:[%s6510_s2 + $0x10] sm:$0xff]  ;;  %v66_v2 = vld [vmem:[%s6511_s1] sm:$0xff]  ;;  %4608 = vset.pattern.permute.xlu1 %v4664_v3  ;;  %4607 = vset.pattern.permute.xlu0 %v4664_v3  ;;  %vm641_vm1 = vcmask 261120   ;;  %v6520_v46 = vmov 0.0   ;;  %v4667_v50 = vmov 2  }
   0x2   :  { %4251 = vmatprep.subr.mxu1 %v363_v0  ;;  %4255 = vmatprep.mubr.msk.f32.mxu1 %vm72_vm0, %v66_v2  ;;  %v67_v4 = vld [vmem:[%s6511_s1 + $0x8] sm:$0xff]  ;;  %v4736_v5 = vld [vmem:[%s6512_s0 + $0x10] sm:$0xff]  ;;  %v4741_v6 = vld [vmem:[%s6512_s0] sm:$0xff]  ;;  %v4973_v43 = vand.u32 127, %v64_v42 }
   0x3   :  { %4252 = vmatpush3.msra.mxu1 %v363_v0  ;;  %4245 = vmatprep.mubr.msk.f32.mxu0 %vm72_vm0, %v66_v2  ;;  %v68_v7 = vld [vmem:[%s6511_s1 + $0x10] sm:$0xff]  ;;  %v71_v8 = vld [vmem:[%s6510_s2 + $0x8] sm:$0xff]  ;;  %v4755_v9 = vld [vmem:[%s6512_s0 + $0x18] sm:$0xff] }
   0x4   :  { %4253 = vmatprep.subr.mxu1 %v362_v1  ;;  %456 = vperm.xlu1 %4608, %v4736_v5   ;;  %v70_v10 = vld [vmem:[%s6510_s2] sm:$0xff]  ;;  %v4764_v11 = vld [vmem:[%s6512_s0 + $0x8] sm:$0xff]  ;;  %v69_v12 = vld [vmem:[%s6511_s1 + $0x18] sm:$0xff] }
   0x5   :  { %4254 = vmatpush3.msra.mxu1 %v362_v1  ;;  %450 = vperm.xlu0 %4607, %v4741_v6   ;;  %v4775_v13 = vld [vmem:[%s6512_s0 + $0x28] sm:$0xff]  ;;  %v4781_v14 = vld [vmem:[%s6512_s0 + $0x20] sm:$0xff]  ;;  %v4790_v15 = vld [vmem:[%s6512_s0 + $0x38] sm:$0xff] }
   0x6   :  { %4256 = vmatmul.mubr.msk.f32.vlgmr.msra.gmra.mxu1 %vm72_vm0, %v67_v4  ;;  %4241 = vmatprep.subr.mxu0 %v71_v8  ;;  %v4795_v16 = vld [vmem:[%s6512_s0 + $0x30] sm:$0xff]  ;;  %v4803_v17 = vld [vmem:[%s6512_s0 + $0x48] sm:$0xff]  ;;  %v4808_v18 = vld [vmem:[%s6512_s0 + $0x40] sm:$0xff] }
   0x7   :  { %4258 = vmatprep.mubr.msk.f32.mxu1 %vm72_vm0, %v68_v7  ;;  %4242 = vmatpush3.msra.mxu0 %v71_v8  ;;  %v4815_v19 = vld [vmem:[%s6512_s0 + $0x58] sm:$0xff]  ;;  %v4820_v20 = vld [vmem:[%s6512_s0 + $0x50] sm:$0xff]  ;;  %v4827_v21 = vld [vmem:[%s6512_s0 + $0x68] sm:$0xff] }
   0x8   :  { %459 = vperm.xlu1 %4608, %v4755_v9   ;;  %4243 = vmatprep.subr.mxu0 %v70_v10  ;;  %6546 = vst [vmem:[#allocation2_spill] sm:$0xff] %v4815_v19  ;;  %v4832_v22 = vld [vmem:[%s6512_s0 + $0x60] sm:$0xff]  ;;  %v4839_v23 = vld [vmem:[%s6512_s0 + $0x78] sm:$0xff]  ;;  %v4844_v24 = vld [vmem:[%s6512_s0 + $0x70] sm:$0xff] }
   0x9   :  { %453 = vperm.xlu0 %4607, %v4764_v11   ;;  %4244 = vmatpush3.msra.mxu0 %v70_v10  ;;  %6547 = vst [vmem:[#allocation3_spill] sm:$0xff] %v4839_v23  ;;  %v4851_v25 = vld [vmem:[%s6512_s0 + $0x88] sm:$0xff]  ;;  %v4856_v26 = vld [vmem:[%s6512_s0 + $0x80] sm:$0xff]  ;;  %v4863_v27 = vld [vmem:[%s6512_s0 + $0x98] sm:$0xff] }
   0xa   :  { %4259 = vmatmul.mubr.msk.f32.gmra.mxu1 %vm72_vm0, %v69_v12  ;;  %4246 = vmatmul.mubr.msk.f32.vlgmr.msra.gmra.mxu0 %vm72_vm0, %v67_v4  ;;  %6548 = vst [vmem:[#allocation4_spill] sm:$0xff] %v4851_v25  ;;  %6549 = vst [vmem:[#allocation5_spill] sm:$0xff] %v4863_v27  ;;  %v4868_v28 = vld [vmem:[%s6512_s0 + $0x90] sm:$0xff]  ;;  %v4875_v29 = vld [vmem:[%s6512_s0 + $0xa8] sm:$0xff] }
   0xb   :  { %4248 = vmatprep.mubr.msk.f32.mxu0 %vm72_vm0, %v68_v7  ;;  %6550 = vst [vmem:[#allocation6_spill] sm:$0xff] %v4868_v28  ;;  %6551 = vst [vmem:[#allocation7_spill] sm:$0xff] %v4875_v29  ;;  %v4880_v30 = vld [vmem:[%s6512_s0 + $0xa0] sm:$0xff]  ;;  %v4887_v31 = vld [vmem:[%s6512_s0 + $0xb8] sm:$0xff] }
   0xc   :  { %465 = vperm.xlu1 %4608, %v4775_v13   ;;  %v4892_v32 = vld [vmem:[%s6512_s0 + $0xb0] sm:$0xff]  ;;  %v4899_v33 = vld [vmem:[%s6512_s0 + $0xc8] sm:$0xff]  ;;  %v4904_v34 = vld [vmem:[%s6512_s0 + $0xc0] sm:$0xff] }
   0xd   :  { %462 = vperm.xlu0 %4607, %v4781_v14   ;;  %6552 = vst [vmem:[#allocation8_spill] sm:$0xff] %v4892_v32  ;;  %6553 = vst [vmem:[#allocation9_spill] sm:$0xff] %v4899_v33  ;;  %v4911_v35 = vld [vmem:[%s6512_s0 + $0xd8] sm:$0xff]  ;;  %v4916_v36 = vld [vmem:[%s6512_s0 + $0xd0] sm:$0xff] }
   0xe   :  { %4249 = vmatmul.mubr.msk.f32.gmra.mxu0 %vm72_vm0, %v69_v12  ;;  %6554 = vst [vmem:[#allocation10_spill] sm:$0xff] %v4916_v36  ;;  %v4923_v37 = vld [vmem:[%s6512_s0 + $0xe8] sm:$0xff]  ;;  %v4928_v38 = vld [vmem:[%s6512_s0 + $0xe0] sm:$0xff]  ;;  %v4935_v39 = vld [vmem:[%s6512_s0 + $0xf8] sm:$0xff] }
   0xf   :  { %6555 = vst [vmem:[#allocation11_spill] sm:$0xff] %v4923_v37  ;;  %v4940_v40 = vld [vmem:[%s6512_s0 + $0xf0] sm:$0xff] }
  0x10   :  { %471 = vperm.xlu1 %4608, %v4790_v15   ;;  %6556 = vst [vmem:[#allocation12_spill] sm:$0xff] %v4940_v40 }
  0x11   :  { %468 = vperm.xlu0 %4607, %v4795_v16  }
  0x14   :  { %477 = vperm.xlu1 %4608, %v4803_v17  }
  0x15   :  { %474 = vperm.xlu0 %4607, %v4808_v18  }
  0x18   :  { %483 = vperm.xlu1 %4608, %v4815_v19  }
  0x19   :  { %480 = vperm.xlu0 %4607, %v4820_v20  }
  0x1c   :  { %489 = vperm.xlu1 %4608, %v4827_v21  }
  0x1d   :  { %486 = vperm.xlu0 %4607, %v4832_v22  }
  0x20   :  { %495 = vperm.xlu1 %4608, %v4839_v23  }
  0x21   :  { %492 = vperm.xlu0 %4607, %v4844_v24  }
  0x24   :  { %501 = vperm.xlu1 %4608, %v4851_v25  }
  0x25   :  { %498 = vperm.xlu0 %4607, %v4856_v26  }
  0x28   :  { %507 = vperm.xlu1 %4608, %v4863_v27  }
  0x29   :  { %504 = vperm.xlu0 %4607, %v4868_v28  }
  0x2c   :  { %513 = vperm.xlu1 %4608, %v4875_v29  }
  0x2d   :  { %510 = vperm.xlu0 %4607, %v4880_v30  }
  0x30   :  { %519 = vperm.xlu1 %4608, %v4887_v31  }
  0x31   :  { %516 = vperm.xlu0 %4607, %v4892_v32  }
  0x34   :  { %525 = vperm.xlu1 %4608, %v4899_v33  }
  0x35   :  { %522 = vperm.xlu0 %4607, %v4904_v34  }
  0x38   :  { %531 = vperm.xlu1 %4608, %v4911_v35  }
  0x39   :  { %528 = vperm.xlu0 %4607, %v4916_v36  }
  0x3c   :  { %537 = vperm.xlu1 %4608, %v4923_v37  }
  0x3d   :  { %534 = vperm.xlu0 %4607, %v4928_v38  }
  0x40   :  { %543 = vperm.xlu1 %4608, %v4935_v39  }
  0x41   :  { %540 = vperm.xlu0 %4607, %v4940_v40  }
  0x44   :  { %4610 = vset.pattern.permute.xlu1 %v4665_v41 }
  0x45   :  { %174 = vperm.xlu1 %4610, %v4764_v11   ;;  %4609 = vset.pattern.permute.xlu0 %v4665_v41 }
  0x46   :  { %171 = vperm.xlu0 %4609, %v4741_v6  }
  0x49   :  { %177 = vperm.xlu1 %4610, %v4736_v5  }
  0x4a   :  { %180 = vperm.xlu0 %4609, %v4755_v9  }
  0x4d   :  { %183 = vperm.xlu1 %4610, %v4781_v14  }
  0x4e   :  { %186 = vperm.xlu0 %4609, %v4775_v13  }
  0x51   :  { %189 = vperm.xlu1 %4610, %v4795_v16  }
  0x52   :  { %192 = vperm.xlu0 %4609, %v4790_v15  }
  0x55   :  { %195 = vperm.xlu1 %4610, %v4808_v18  }
  0x56   :  { %198 = vperm.xlu0 %4609, %v4803_v17  }
  0x59   :  { %201 = vperm.xlu1 %4610, %v4820_v20  }
  0x5a   :  { %204 = vperm.xlu0 %4609, %v4815_v19  }
  0x5d   :  { %207 = vperm.xlu1 %4610, %v4832_v22  }
  0x5e   :  { %210 = vperm.xlu0 %4609, %v4827_v21  }
  0x61   :  { %213 = vperm.xlu1 %4610, %v4844_v24  }
  0x62   :  { %216 = vperm.xlu0 %4609, %v4839_v23  }
  0x65   :  { %219 = vperm.xlu1 %4610, %v4856_v26  }
  0x66   :  { %222 = vperm.xlu0 %4609, %v4851_v25  }
  0x69   :  { %225 = vperm.xlu1 %4610, %v4868_v28  }
  0x6a   :  { %228 = vperm.xlu0 %4609, %v4863_v27  }
  0x6d   :  { %231 = vperm.xlu1 %4610, %v4880_v30  }
  0x6e   :  { %234 = vperm.xlu0 %4609, %v4875_v29  }
  0x71   :  { %237 = vperm.xlu1 %4610, %v4892_v32  }
  0x72   :  { %240 = vperm.xlu0 %4609, %v4887_v31  }
  0x75   :  { %243 = vperm.xlu1 %4610, %v4904_v34  }
  0x76   :  { %246 = vperm.xlu0 %4609, %v4899_v33  }
  0x79   :  { %249 = vperm.xlu1 %4610, %v4916_v36  }
  0x7a   :  { %252 = vperm.xlu0 %4609, %v4911_v35  }
  0x7d   :  { %255 = vperm.xlu1 %4610, %v4928_v38  }
  0x7e   :  { %258 = vperm.xlu0 %4609, %v4923_v37  }
  0x7f   :  { %v4976_v44 = vpop.permute.xlu1 %456 }
  0x80   :  { %v451_v45 = vpop.permute.xlu0 %450  ;;  %vm547_vm4 = vcmp.eq.s32.totalorder %v4976_v44, %v4973_v43 }
  0x81   :  { %261 = vperm.xlu1 %4610, %v4940_v40   ;;  %vm545_vm2 = vcmp.eq.s32.totalorder %v451_v45, %v4973_v43 }
  0x82   :  { %v3712_v47 = vsel %vm545_vm2, 1.0, %v6520_v46  ;;  %264 = vperm.xlu0 %4609, %v4935_v39  }
  0x83   :  { %v4982_v48 = vpop.permute.xlu1 %459  ;;  %4269 = vmatprep.mubr.msk.f32.mxu0 %vm641_vm1, %v3712_v47 }
  0x84   :  { %v4985_v49 = vpop.permute.xlu0 %453  ;;  %vm548_vm5 = vcmp.eq.s32.totalorder %v4982_v48, %v4973_v43 }
  0x85   :  { %4611 = vset.pattern.permute.xlu1 %v4667_v50  ;;  %vm546_vm3 = vcmp.eq.s32.totalorder %v4985_v49, %v4973_v43 }
  0x86   :  { %1372 = vperm.xlu1 %4611, %v4741_v6   ;;  %4612 = vset.pattern.permute.xlu0 %v4667_v50 }
  0x87   :  { %v4988_v51 = vpop.permute.xlu1 %465  ;;  %1375 = vperm.xlu0 %4612, %v4764_v11  }
  0x88   :  { %v4991_v52 = vpop.permute.xlu0 %462  ;;  %vm550_vm7 = vcmp.eq.s32.totalorder %v4988_v51, %v4973_v43 }
  0x89   :  { %vm549_vm6 = vcmp.eq.s32.totalorder %v4991_v52, %v4973_v43 }
  0x8a   :  { %1378 = vperm.xlu1 %4611, %v4736_v5  }
  0x8b   :  { %v4994_v53 = vpop.permute.xlu1 %471  ;;  %1384 = vperm.xlu0 %4612, %v4781_v14  }
  0x8c   :  { %v4997_v54 = vpop.permute.xlu0 %468  ;;  %vm552_vm11 = vcmp.eq.s32.totalorder %v4994_v53, %v4973_v43  ;;  %v6563_v53 = vmov 3  }
  0x8d   :  { %vm551_vm8 = vcmp.eq.s32.totalorder %v4997_v54, %v4973_v43 }
  0x8e   :  { %1381 = vperm.xlu1 %4611, %v4755_v9  }
  0x8f   :  { %v5000_v55 = vpop.permute.xlu1 %477  ;;  %1390 = vperm.xlu0 %4612, %v4795_v16  }
  0x90   :  { %v5003_v56 = vpop.permute.xlu0 %474  ;;  %vm554_vm15 = vcmp.eq.s32.totalorder %v5000_v55, %v4973_v43 }
  0x91   :  { %vm553_vm12 = vcmp.eq.s32.totalorder %v5003_v56, %v4973_v43  ;;  %v5162_v56 = vld [vmem:[%s6510_s2 + $0x28] sm:$0xff] }
  0x92   :  { %1387 = vperm.xlu1 %4611, %v4775_v13  }
  0x93   :  { %v5006_v57 = vpop.permute.xlu1 %483  ;;  %1396 = vperm.xlu0 %4612, %v4808_v18  }
  0x94   :  { %v5009_v58 = vpop.permute.xlu0 %480 }
  0x95   :  { %vm555_vm2 = vcmp.eq.s32.totalorder %v5009_v58, %v4973_v43 }
  0x96   :  { %1393 = vperm.xlu1 %4611, %v4790_v15  }
  0x97   :  { %v5012_v59 = vpop.permute.xlu1 %489  ;;  %1402 = vperm.xlu0 %4612, %v4820_v20  }
  0x98   :  { %v5015_v60 = vpop.permute.xlu0 %486 }
  0x9a   :  { %1399 = vperm.xlu1 %4611, %v4803_v17  }
  0x9b   :  { %v5018_v61 = vpop.permute.xlu1 %495  ;;  %1408 = vperm.xlu0 %4612, %v4832_v22  }
  0x9c   :  { %v5021_v62 = vpop.permute.xlu0 %492 }
  0x9e   :  { %1405 = vperm.xlu1 %4611, %v4815_v19  }
  0x9f   :  { %v5024_v63 = vpop.permute.xlu1 %501  ;;  %1414 = vperm.xlu0 %4612, %v4844_v24  }
  0xa0   :  { %v5027_v0 = vpop.permute.xlu0 %498 }
  0xa2   :  { %1411 = vperm.xlu1 %4611, %v4827_v21  }
  0xa3   :  { %v5030_v1 = vpop.permute.xlu1 %507  ;;  %1420 = vperm.xlu0 %4612, %v4856_v26  }
  0xa4   :  { %v5033_v2 = vpop.permute.xlu0 %504 }
  0xa6   :  { %1417 = vperm.xlu1 %4611, %v4839_v23   ;;  %v6540_v23 = vmov 3  }
  0xa7   :  { %v5036_v3 = vpop.permute.xlu1 %513  ;;  %1426 = vperm.xlu0 %4612, %v4868_v28  }
  0xa8   :  { %v5039_v4 = vpop.permute.xlu0 %510 }
  0xaa   :  { %1423 = vperm.xlu1 %4611, %v4851_v25  }
  0xab   :  { %v5042_v7 = vpop.permute.xlu1 %519  ;;  %1432 = vperm.xlu0 %4612, %v4880_v30  }
  0xac   :  { %v5045_v8 = vpop.permute.xlu0 %516 }
  0xae   :  { %1429 = vperm.xlu1 %4611, %v4863_v27  }
  0xaf   :  { %v5048_v10 = vpop.permute.xlu1 %525  ;;  %1438 = vperm.xlu0 %4612, %v4892_v32  }
  0xb0   :  { %v5051_v12 = vpop.permute.xlu0 %522 }
  0xb2   :  { %1435 = vperm.xlu1 %4611, %v4875_v29  }
  0xb3   :  { %v5054_v41 = vpop.permute.xlu1 %531  ;;  %1444 = vperm.xlu0 %4612, %v4904_v34  }
  0xb4   :  { %v5057_v42 = vpop.permute.xlu0 %528 }
  0xb6   :  { %1441 = vperm.xlu1 %4611, %v4887_v31  }
  0xb7   :  { %v5060_v45 = vpop.permute.xlu1 %537  ;;  %1450 = vperm.xlu0 %4612, %v4916_v36  }
  0xb8   :  { %v5063_v47 = vpop.permute.xlu0 %534 }
  0xba   :  { %1447 = vperm.xlu1 %4611, %v4899_v33  }
  0xbb   :  { %v5066_v50 = vpop.permute.xlu1 %543  ;;  %1456 = vperm.xlu0 %4612, %v4928_v38  }
  0xbc   :  { %v5069_v46 = vpop.permute.xlu0 %540 }
  0xbe   :  { %1453 = vperm.xlu1 %4611, %v4911_v35  }
  0xbf   :  { %1462 = vperm.xlu0 %4612, %v4940_v40  }
  0xc0   :  { %v5073_v27 = vpop.permute.xlu1 %174 }
  0xc1   :  { %v5075_v31 = vpop.permute.xlu0 %171 }
  0xc2   :  { %1459 = vperm.xlu1 %4611, %v4923_v37  }
  0xc3   :  { %4613 = vset.pattern.permute.xlu0 %v6540_v23 }
  0xc4   :  { %v5079_v36 = vpop.permute.xlu1 %177  ;;  %2004 = vperm.xlu0 %4613, %v4741_v6  }
  0xc5   :  { %v5082_v33 = vpop.permute.xlu0 %180 }
  0xc6   :  { %6557 = vst [vmem:[#allocation13_spill] sm:$0xff] %v5082_v33  ;;  %v4257_v32 = vpop.f32.mrf.mxu1  ;;  %1465 = vperm.xlu1 %4611, %v4935_v39  }
  0xc8   :  { %v430_v35 = vpop.f32.mrf.mxu1  ;;  %v5085_v40 = vpop.permute.xlu1 %183  ;;  %2016 = vperm.xlu0 %4613, %v4781_v14  }
  0xc9   :  { %6558 = vst [vmem:[#allocation14_spill] sm:$0xff] %v5085_v40  ;;  %v5088_v29 = vpop.permute.xlu0 %186 }
  0xca   :  { %6559 = vst [vmem:[#allocation15_spill] sm:$0xff] %v5088_v29  ;;  %v4260_v37 = vpop.f32.mrf.mxu1  ;;  %v5090_v28 = vpop.f32.mrf.mxu0  ;;  %4614 = vset.pattern.permute.xlu1 %v6540_v23  ;;  %v4669_v29 = vmov 4  }
  0xcb   :  { %4261 = vmatprep.subr.mxu0 %v4260_v37  ;;  %2007 = vperm.xlu1 %4614, %v4764_v11  }
  0xcc   :  { %v440_v25 = vpop.f32.mrf.mxu1  ;;  %4262 = vmatpush3.msra.mxu0 %v4260_v37  ;;  %v5094_v19 = vpop.permute.xlu1 %189  ;;  %2028 = vperm.xlu0 %4613, %v4808_v18  }
  0xcd   :  { %6560 = vst [vmem:[#allocation16_spill] sm:$0xff] %v5094_v19  ;;  %4263 = vmatprep.subr.mxu0 %v440_v25  ;;  %v5097_v39 = vpop.permute.xlu0 %192  ;;  %v5099_v40 = vpop.f32.mrf.mxu0 }
  0xce   :  { %6561 = vst [vmem:[#allocation17_spill] sm:$0xff] %v5097_v39  ;;  %4264 = vmatpush3.msra.mxu0 %v440_v25  ;;  %v6562_v25 = vmov 0.0  }
  0xcf   :  { %4265 = vmatprep.subr.mxu0 %v4257_v32  ;;  %v4250_v23 = vpop.f32.mrf.mxu0  ;;  %4615 = vset.pattern.permute.xlu1 %v4669_v29  ;;  %v3713_v33 = vsel %vm546_vm3, 1.0, %v6562_v25  ;;  %v3714_v49 = vsel %vm547_vm4, 1.0, %v6562_v25  ;;  %v3717_v51 = vsel %vm550_vm7, 1.0, %v6562_v25  ;;  %v3718_v54 = vsel %vm551_vm8, 1.0, %v6562_v25 }
  0xd0   :  { %4266 = vmatpush3.msra.mxu0 %v4257_v32  ;;  %v5106_v37 = vpop.permute.xlu1 %195  ;;  %4593 = vmatprep.subr.mxu1 %v4250_v23 }
  0xd1   :  { %4267 = vmatprep.subr.mxu0 %v430_v35  ;;  %v5108_v39 = vpop.permute.xlu0 %198  ;;  %v161_v19 = vpop.f32.mrf.mxu0  ;;  %4597 = vmatpush3.msra.mxu1 %v4250_v23 }
  0xd2   :  { %4268 = vmatpush3.msra.mxu0 %v430_v35  ;;  %4594 = vmatprep.subr.mxu1 %v161_v19  ;;  %v3715_v35 = vsel %vm548_vm5, 1.0, %v6562_v25  ;;  %vm556_vm5 = vcmp.eq.s32.totalorder %v5006_v57, %v4973_v43 }
  0xd3   :  { %4270 = vmatmul.mubr.msk.f32.vlgmr.msra.gmra.mxu0 %vm641_vm1, %v3713_v33  ;;  %4598 = vmatpush3.msra.mxu1 %v161_v19  ;;  %v3716_v33 = vsel %vm549_vm6, 1.0, %v6562_v25  ;;  %vm557_vm6 = vcmp.eq.s32.totalorder %v5015_v60, %v4973_v43  ;;  %v3723_v57 = vsel %vm556_vm5, 1.0, %v6562_v25 }
  0xd4   :  { %4272 = vmatprep.mubr.msk.f32.mxu0 %vm641_vm1, %v3714_v49  ;;  %v5118_v32 = vpop.permute.xlu1 %201  ;;  %4595 = vmatprep.subr.mxu1 %v5090_v28  ;;  %v3724_v60 = vsel %vm557_vm6, 1.0, %v6562_v25 }
  0xd5   :  { %v5121_v44 = vpop.permute.xlu0 %204  ;;  %4317 = vmatprep.subr.mxu0 %v4250_v23  ;;  %4599 = vmatpush3.msra.mxu1 %v5090_v28 }
  0xd6   :  { %4318 = vmatpush3.msra.mxu0 %v4250_v23  ;;  %4596 = vmatprep.subr.mxu1 %v5099_v40 }
  0xd7   :  { %4273 = vmatmul.mubr.msk.f32.gmra.mxu0 %vm641_vm1, %v3715_v35  ;;  %4319 = vmatprep.subr.mxu0 %v161_v19  ;;  %v3719_v35 = vsel %vm552_vm11, 1.0, %v6562_v25 }
  0xd8   :  { %4275 = vmatprep.mubr.msk.f32.mxu0 %vm641_vm1, %v3716_v33  ;;  %v208_v48 = vpop.permute.xlu1 %207  ;;  %4600 = vmatpush3.msra.mxu1 %v5099_v40 }
  0xd9   :  { %vm278_vm9 = vcmp.eq.s32.totalorder %v208_v48, %v4973_v43  ;;  %v211_v23 = vpop.permute.xlu0 %210  ;;  %4320 = vmatpush3.msra.mxu0 %v161_v19  ;;  %2636 = vperm.xlu1 %4615, %v4741_v6  }
  0xda   :  { %v3688_v52 = vsel %vm278_vm9, 1.0, %v6562_v25  ;;  %vm279_vm10 = vcmp.eq.s32.totalorder %v211_v23, %v4973_v43  ;;  %4321 = vmatprep.subr.mxu0 %v5090_v28  ;;  %2040 = vperm.xlu0 %4613, %v4832_v22   ;;  %vm558_vm9 = vcmp.eq.s32.totalorder %v5012_v59, %v4973_v43 }
  0xdb   :  { %4276 = vmatmul.mubr.msk.f32.gmra.mxu0 %vm641_vm1, %v3717_v51  ;;  %v3689_v19 = vsel %vm279_vm10, 1.0, %v6562_v25  ;;  %4343 = vmatprep.mubr.msk.f32.mxu1 %vm641_vm1, %v3688_v52  ;;  %v3721_v51 = vsel %vm554_vm15, 1.0, %v6562_v25  ;;  %vm559_vm10 = vcmp.eq.s32.totalorder %v5021_v62, %v4973_v43 }
  0xdc   :  { %4278 = vmatprep.mubr.msk.f32.mxu0 %vm641_vm1, %v3718_v54  ;;  %v214_v6 = vpop.permute.xlu1 %213  ;;  %4344 = vmatmul.mubr.msk.f32.vlgmr.msra.gmra.mxu1 %vm641_vm1, %v3689_v19  ;;  %v3726_v62 = vsel %vm559_vm10, 1.0, %v6562_v25 }
  0xdd   :  { %vm280_vm13 = vcmp.eq.s32.totalorder %v214_v6, %v4973_v43  ;;  %v217_v49 = vpop.permute.xlu0 %216  ;;  %4322 = vmatpush3.msra.mxu0 %v5090_v28  ;;  %4616 = vset.pattern.permute.xlu1 %v6563_v53  ;;  %v3720_v28 = vsel %vm553_vm12, 1.0, %v6562_v25 }
  0xde   :  { %v3690_v33 = vsel %vm280_vm13, 1.0, %v6562_v25  ;;  %vm281_vm14 = vcmp.eq.s32.totalorder %v217_v49, %v4973_v43  ;;  %4323 = vmatprep.subr.mxu0 %v5099_v40  ;;  %2010 = vperm.xlu1 %4616, %v4736_v5   ;;  %vm560_vm13 = vcmp.eq.s32.totalorder %v5018_v61, %v4973_v43 }
  0xdf   :  { %4279 = vmatmul.mubr.msk.f32.gmra.mxu0 %vm641_vm1, %v3719_v35  ;;  %v3691_v48 = vsel %vm281_vm14, 1.0, %v6562_v25  ;;  %4346 = vmatprep.mubr.msk.f32.mxu1 %vm641_vm1, %v3690_v33  ;;  %v3725_v33 = vsel %vm558_vm9, 1.0, %v6562_v25  ;;  %vm561_vm14 = vcmp.eq.s32.totalorder %v5027_v0, %v4973_v43  ;;  %v3727_v61 = vsel %vm560_vm13, 1.0, %v6562_v25 }
  0xe0   :  { %4281 = vmatprep.mubr.msk.f32.mxu0 %vm641_vm1, %v3720_v28  ;;  %v220_v23 = vpop.permute.xlu1 %219  ;;  %4324 = vmatpush3.msra.mxu0 %v5099_v40  ;;  %v3722_v40 = vsel %vm555_vm2, 1.0, %v6562_v25  ;;  %v3728_v0 = vsel %vm561_vm14, 1.0, %v6562_v25 }
  0xe1   :  { %vm282_vm3 = vcmp.eq.s32.totalorder %v220_v23, %v4973_v43  ;;  %4347 = vmatmul.mubr.msk.f32.gmra.mxu1 %vm641_vm1, %v3691_v48  ;;  %v223_v55 = vpop.permute.xlu0 %222  ;;  %4373 = vmatprep.subr.mxu0 %v5162_v56 }
  0xe2   :  { %v3692_v52 = vsel %vm282_vm3, 1.0, %v6562_v25  ;;  %vm283_vm4 = vcmp.eq.s32.totalorder %v223_v55, %v4973_v43  ;;  %2013 = vperm.xlu1 %4616, %v4755_v9   ;;  %2052 = vperm.xlu0 %4613, %v4856_v26   ;;  %vm562_vm3 = vcmp.eq.s32.totalorder %v5024_v63, %v4973_v43 }
  0xe3   :  { %4282 = vmatmul.mubr.msk.f32.gmra.mxu0 %vm641_vm1, %v3721_v51  ;;  %v3693_v58 = vsel %vm283_vm4, 1.0, %v6562_v25  ;;  %4349 = vmatprep.mubr.msk.f32.mxu1 %vm641_vm1, %v3692_v52  ;;  %vm563_vm4 = vcmp.eq.s32.totalorder %v5033_v2, %v4973_v43  ;;  %v3729_v63 = vsel %vm562_vm3, 1.0, %v6562_v25 }
  0xe4   :  { %4284 = vmatprep.mubr.msk.f32.mxu0 %vm641_vm1, %v3722_v40  ;;  %v226_v54 = vpop.permute.xlu1 %225  ;;  %v3730_v2 = vsel %vm563_vm4, 1.0, %v6562_v25 }
  0xe5   :  { %vm284_vm7 = vcmp.eq.s32.totalorder %v226_v54, %v4973_v43  ;;  %4350 = vmatmul.mubr.msk.f32.gmra.mxu1 %vm641_vm1, %v3693_v58  ;;  %v229_v19 = vpop.permute.xlu0 %228 }
  0xe6   :  { %v3694_v6 = vsel %vm284_vm7, 1.0, %v6562_v25  ;;  %vm285_vm8 = vcmp.eq.s32.totalorder %v229_v19, %v4973_v43  ;;  %4617 = vset.pattern.permute.xlu1 %v4669_v29  ;;  %2064 = vperm.xlu0 %4613, %v4880_v30   ;;  %vm564_vm7 = vcmp.eq.s32.totalorder %v5030_v1, %v4973_v43 }
  0xe7   :  { %4285 = vmatmul.mubr.msk.f32.gmra.mxu0 %vm641_vm1, %v3723_v57  ;;  %v3695_v49 = vsel %vm285_vm8, 1.0, %v6562_v25  ;;  %4352 = vmatprep.mubr.msk.f32.mxu1 %vm641_vm1, %v3694_v6  ;;  %vm565_vm8 = vcmp.eq.s32.totalorder %v5039_v4, %v4973_v43  ;;  %v3731_v1 = vsel %vm564_vm7, 1.0, %v6562_v25 }
  0xe8   :  { %4287 = vmatprep.mubr.msk.f32.mxu0 %vm641_vm1, %v3724_v60  ;;  %v232_v35 = vpop.permute.xlu1 %231  ;;  %2645 = vperm.xlu1 %4617, %v4755_v9   ;;  %v3732_v4 = vsel %vm565_vm8, 1.0, %v6562_v25  ;;  %vm572_vm8 = vcmp.eq.s32.totalorder %v5054_v41, %v4973_v43 }
  0xe9   :  { %vm286_vm11 = vcmp.eq.s32.totalorder %v232_v35, %v4973_v43  ;;  %4353 = vmatmul.mubr.msk.f32.gmra.mxu1 %vm641_vm1, %v3695_v49  ;;  %v235_v59 = vpop.permute.xlu0 %234 }
  0xea   :  { %v3696_v28 = vsel %vm286_vm11, 1.0, %v6562_v25  ;;  %vm287_vm12 = vcmp.eq.s32.totalorder %v235_v59, %v4973_v43  ;;  %2076 = vperm.xlu0 %4613, %v4904_v34   ;;  %vm566_vm11 = vcmp.eq.s32.totalorder %v5036_v3, %v4973_v43 }
  0xeb   :  { %4288 = vmatmul.mubr.msk.f32.gmra.mxu0 %vm641_vm1, %v3725_v33  ;;  %v3697_v9 = vsel %vm287_vm12, 1.0, %v6562_v25  ;;  %4355 = vmatprep.mubr.msk.f32.mxu1 %vm641_vm1, %v3696_v28  ;;  %vm567_vm12 = vcmp.eq.s32.totalorder %v5045_v8, %v4973_v43  ;;  %v3733_v57 = vsel %vm566_vm11, 1.0, %v6562_v25  ;;  %vm575_vm11 = vcmp.eq.s32.totalorder %v5069_v46, %v4973_v43 }
  0xec   :  { %4290 = vmatprep.mubr.msk.f32.mxu0 %vm641_vm1, %v3726_v62  ;;  %v238_v48 = vpop.permute.xlu1 %237  ;;  %4618 = vset.pattern.permute.xlu1 %v6563_v53  ;;  %v3734_v8 = vsel %vm567_vm12, 1.0, %v6562_v25  ;;  %vm266_vm12 = vcmp.eq.s32.totalorder %v5075_v31, %v4973_v43 }
  0xed   :  { %vm288_vm15 = vcmp.eq.s32.totalorder %v238_v48, %v4973_v43  ;;  %4356 = vmatmul.mubr.msk.f32.gmra.mxu1 %vm641_vm1, %v3697_v9  ;;  %v241_v34 = vpop.permute.xlu0 %240  ;;  %2019 = vperm.xlu1 %4618, %v4775_v13   ;;  %v3676_v46 = vsel %vm266_vm12, 1.0, %v6562_v25  ;;  %v6564_v9 = vld [vmem:[#allocation13_spill] sm:$0xff]  ;;  %v6566_v48 = vld [vmem:[#allocation2_spill] sm:$0xff] }
  0xee   :  { %v3698_v23 = vsel %vm288_vm15, 1.0, %v6562_v25  ;;  %vm289_vm2 = vcmp.eq.s32.totalorder %v241_v34, %v4973_v43  ;;  %2088 = vperm.xlu0 %4613, %v4928_v38   ;;  %vm568_vm15 = vcmp.eq.s32.totalorder %v5042_v7, %v4973_v43 }
  0xef   :  { %4291 = vmatmul.mubr.msk.f32.gmra.mxu0 %vm641_vm1, %v3727_v61  ;;  %v3699_v55 = vsel %vm289_vm2, 1.0, %v6562_v25  ;;  %4358 = vmatprep.mubr.msk.f32.mxu1 %vm641_vm1, %v3698_v23  ;;  %vm569_vm2 = vcmp.eq.s32.totalorder %v5051_v12, %v4973_v43  ;;  %v3735_v49 = vsel %vm568_vm15, 1.0, %v6562_v25  ;;  %vm268_vm15 = vcmp.eq.s32.totalorder %v5079_v36, %v4973_v43  ;;  %v6565_v36 = vld [vmem:[#allocation14_spill] sm:$0xff]  ;;  %v6567_v23 = vld [vmem:[#allocation4_spill] sm:$0xff] }
  0xf0   :  { %4293 = vmatprep.mubr.msk.f32.mxu0 %vm641_vm1, %v3728_v0  ;;  %v244_v51 = vpop.permute.xlu1 %243  ;;  %v3736_v12 = vsel %vm569_vm2, 1.0, %v6562_v25  ;;  %v3678_v62 = vsel %vm268_vm15, 1.0, %v6562_v25  ;;  %vm269_vm2 = vcmp.eq.s32.totalorder %v6564_v9, %v4973_v43 }
  0xf1   :  { %vm290_vm5 = vcmp.eq.s32.totalorder %v244_v51, %v4973_v43  ;;  %4359 = vmatmul.mubr.msk.f32.gmra.mxu1 %vm641_vm1, %v3699_v55  ;;  %v247_v38 = vpop.permute.xlu0 %246  ;;  %4619 = vset.pattern.permute.xlu1 %v4669_v29  ;;  %v3679_v61 = vsel %vm269_vm2, 1.0, %v6562_v25  ;;  %v6568_v55 = vld [vmem:[#allocation15_spill] sm:$0xff] }
  0xf2   :  { %v3700_v52 = vsel %vm290_vm5, 1.0, %v6562_v25  ;;  %vm291_vm6 = vcmp.eq.s32.totalorder %v247_v38, %v4973_v43  ;;  %2648 = vperm.xlu1 %4619, %v4781_v14   ;;  %4642 = vset.pattern.permute.xlu0 %v4669_v29  ;;  %vm570_vm5 = vcmp.eq.s32.totalorder %v5048_v10, %v4973_v43 }
  0xf3   :  { %4294 = vmatmul.mubr.msk.f32.gmra.mxu0 %vm641_vm1, %v3729_v63  ;;  %v3701_v40 = vsel %vm291_vm6, 1.0, %v6562_v25  ;;  %4361 = vmatprep.mubr.msk.f32.mxu1 %vm641_vm1, %v3700_v52  ;;  %vm571_vm6 = vcmp.eq.s32.totalorder %v5057_v42, %v4973_v43  ;;  %v3737_v10 = vsel %vm570_vm5, 1.0, %v6562_v25  ;;  %v6570_v63 = vld [vmem:[#allocation6_spill] sm:$0xff] }
  0xf4   :  { %4296 = vmatprep.mubr.msk.f32.mxu0 %vm641_vm1, %v3730_v2  ;;  %v250_v58 = vpop.permute.xlu1 %249  ;;  %2639 = vperm.xlu0 %4642, %v4764_v11   ;;  %v3738_v42 = vsel %vm571_vm6, 1.0, %v6562_v25  ;;  %v6571_v2 = vld [vmem:[#allocation17_spill] sm:$0xff] }
  0xf5   :  { %vm292_vm9 = vcmp.eq.s32.totalorder %v250_v58, %v4973_v43  ;;  %4362 = vmatmul.mubr.msk.f32.gmra.mxu1 %vm641_vm1, %v3701_v40  ;;  %v253_v14 = vpop.permute.xlu0 %252  ;;  %vm273_vm6 = vcmp.eq.s32.totalorder %v6571_v2, %v4973_v43  ;;  %v4659_v2 = vld [vmem:[%s6512_s0 + $0xd8] sm:$0xff] }
  0xf6   :  { %v3702_v54 = vsel %vm292_vm9, 1.0, %v6562_v25  ;;  %vm293_vm10 = vcmp.eq.s32.totalorder %v253_v14, %v4973_v43  ;;  %4620 = vset.pattern.permute.xlu1 %v6563_v53  ;;  %vm573_vm9 = vcmp.eq.s32.totalorder %v5063_v47, %v4973_v43  ;;  %v3683_v58 = vsel %vm273_vm6, 1.0, %v6562_v25  ;;  %v6572_v14 = vld [vmem:[#allocation7_spill] sm:$0xff] }
  0xf7   :  { %4297 = vmatmul.mubr.msk.f32.gmra.mxu0 %vm641_vm1, %v3731_v1  ;;  %v3703_v11 = vsel %vm293_vm10, 1.0, %v6562_v25  ;;  %4364 = vmatprep.mubr.msk.f32.mxu1 %vm641_vm1, %v3702_v54  ;;  %vm574_vm10 = vcmp.eq.s32.totalorder %v5060_v45, %v4973_v43  ;;  %v3740_v41 = vsel %vm573_vm9, 1.0, %v6562_v25  ;;  %vm276_vm9 = vcmp.eq.s32.totalorder %v5118_v32, %v4973_v43  ;;  %v6575_v32 = vld [vmem:[#allocation9_spill] sm:$0xff] }
  0xf8   :  { %4299 = vmatprep.mubr.msk.f32.mxu0 %vm641_vm1, %v3732_v4  ;;  %v256_v19 = vpop.permute.xlu1 %255  ;;  %2022 = vperm.xlu1 %4620, %v4795_v16   ;;  %v3741_v28 = vsel %vm574_vm10, 1.0, %v6562_v25  ;;  %v6573_v4 = vld [vmem:[#allocation8_spill] sm:$0xff]  ;;  %vm277_vm10 = vcmp.eq.s32.totalorder %v5121_v44, %v4973_v43  ;;  %v5434_v44 = vld [vmem:[%s6511_s1] sm:$0xff] }
  0xf9   :  { %vm294_vm13 = vcmp.eq.s32.totalorder %v256_v19, %v4973_v43  ;;  %4365 = vmatmul.mubr.msk.f32.gmra.mxu1 %vm641_vm1, %v3703_v11  ;;  %v259_v3 = vpop.permute.xlu0 %258  ;;  %2642 = vperm.xlu0 %4642, %v4736_v5   ;;  %v3686_v11 = vsel %vm276_vm9, 1.0, %v6562_v25  ;;  %6576 = vst [vmem:[#allocation14_spill] sm:$0xff] %v5434_v44  ;;  %v1916_v19 = vld [vmem:[%s6510_s2 + $0x30] sm:$0xff] }
  0xfa   :  { %v3704_v6 = vsel %vm294_vm13, 1.0, %v6562_v25  ;;  %vm295_vm14 = vcmp.eq.s32.totalorder %v259_v3, %v4973_v43  ;;  %vm576_vm13 = vcmp.eq.s32.totalorder %v5066_v50, %v4973_v43  ;;  %v6578_v3 = vld [vmem:[#allocation10_spill] sm:$0xff] }
  0xfb   :  { %4300 = vmatmul.mubr.msk.f32.gmra.mxu0 %vm641_vm1, %v3733_v57  ;;  %v3705_v60 = vsel %vm295_vm14, 1.0, %v6562_v25  ;;  %4367 = vmatprep.mubr.msk.f32.mxu1 %vm641_vm1, %v3704_v6  ;;  %vm267_vm14 = vcmp.eq.s32.totalorder %v5073_v27, %v4973_v43  ;;  %v3743_v31 = vsel %vm576_vm13, 1.0, %v6562_v25  ;;  %v1284_v27 = vld [vmem:[%s6510_s2 + $0x20] sm:$0xff]  ;;  %v5449_v57 = vld [vmem:[%s6511_s1 + $0x8] sm:$0xff] }
  0xfc   :  { %4302 = vmatprep.mubr.msk.f32.mxu0 %vm641_vm1, %v3734_v8  ;;  %v262_v5 = vpop.permute.xlu1 %261  ;;  %2025 = vperm.xlu1 %4620, %v4790_v15   ;;  %v3677_v50 = vsel %vm267_vm14, 1.0, %v6562_v25  ;;  %6579 = vst [vmem:[#allocation4_spill] sm:$0xff] %v5449_v57  ;;  %v6581_v6 = vld [vmem:[#allocation3_spill] sm:$0xff] }
  0xfd   :  { %vm296_vm3 = vcmp.eq.s32.totalorder %v262_v5, %v4973_v43  ;;  %4368 = vmatmul.mubr.msk.f32.gmra.mxu1 %vm641_vm1, %v3705_v60  ;;  %v265_v7 = vpop.permute.xlu0 %264  ;;  %2651 = vperm.xlu0 %4642, %v4775_v13   ;;  %v6583_v60 = vld [vmem:[#allocation11_spill] sm:$0xff]  ;;  %v5467_v5 = vld [vmem:[%s6511_s1 + $0x18] sm:$0xff] }
  0xfe   :  { %v3706_v35 = vsel %vm296_vm3, 1.0, %v6562_v25  ;;  %vm297_vm4 = vcmp.eq.s32.totalorder %v265_v7, %v4973_v43  ;;  %vm270_vm3 = vcmp.eq.s32.totalorder %v6565_v36, %v4973_v43  ;;  %6584 = vst [vmem:[#allocation6_spill] sm:$0xff] %v5467_v5 }
  0xff   :  { %4303 = vmatmul.mubr.msk.f32.gmra.mxu0 %vm641_vm1, %v3735_v49  ;;  %v3707_v59 = vsel %vm297_vm4, 1.0, %v6562_v25  ;;  %4370 = vmatprep.mubr.msk.f32.mxu1 %vm641_vm1, %v3706_v35  ;;  %v3680_v0 = vsel %vm270_vm3, 1.0, %v6562_v25  ;;  %vm271_vm4 = vcmp.eq.s32.totalorder %v6568_v55, %v4973_v43  ;;  %v6586_v49 = vld [vmem:[#allocation12_spill] sm:$0xff] }
 0x100   :  { %4305 = vmatprep.mubr.msk.f32.mxu0 %vm641_vm1, %v3736_v12  ;;  %4621 = vset.pattern.permute.xlu1 %v4669_v29  ;;  %v3681_v38 = vsel %vm271_vm4, 1.0, %v6562_v25 }
 0x101   :  { %4371 = vmatmul.mubr.msk.f32.gmra.mxu1 %vm641_vm1, %v3707_v59  ;;  %2657 = vperm.xlu1 %4621, %v4790_v15   ;;  %v1373_v13 = vpop.permute.xlu1 %1372 }
 0x102   :  { %vm1467_vm7 = vcmp.eq.s32.totalorder %v1373_v13, %v4973_v43  ;;  %2654 = vperm.xlu0 %4642, %v4795_v16   ;;  %v3739_v16 = vsel %vm572_vm8, 1.0, %v6562_v25  ;;  %vm275_vm8 = vcmp.eq.s32.totalorder %v5108_v39, %v4973_v43  ;;  %v3687_v39 = vsel %vm277_vm10, 1.0, %v6562_v25  ;;  %v5492_v59 = vpop.permute.xlu0 %1375 }
 0x103   :  { %4306 = vmatmul.mubr.msk.f32.gmra.mxu0 %vm641_vm1, %v3737_v10  ;;  %v3812_v33 = vsel %vm1467_vm7, 1.0, %v6562_v25  ;;  %vm274_vm7 = vcmp.eq.s32.totalorder %v5106_v37, %v4973_v43  ;;  %v3685_v54 = vsel %vm275_vm8, 1.0, %v6562_v25  ;;  %vm1468_vm12 = vcmp.eq.s32.totalorder %v5492_v59, %v4973_v43  ;;  %v2549_v59 = vld [vmem:[%s6510_s2 + $0x48] sm:$0xff] }
 0x104   :  { %4308 = vmatprep.mubr.msk.f32.mxu0 %vm641_vm1, %v3738_v42  ;;  %4391 = vmatprep.mubr.msk.f32.mxu1 %vm641_vm1, %v3812_v33  ;;  %v3684_v1 = vsel %vm274_vm7, 1.0, %v6562_v25  ;;  %v6590_v42 = vld [vmem:[#allocation5_spill] sm:$0xff] }
 0x105   :  { %4622 = vset.pattern.permute.xlu1 %v6563_v53  ;;  %v5321_v15 = vpop.permute.xlu1 %1378 }
 0x106   :  { %2031 = vperm.xlu1 %4622, %v4803_v17   ;;  %2663 = vperm.xlu0 %4642, %v4803_v17   ;;  %v3742_v17 = vsel %vm575_vm11, 1.0, %v6562_v25  ;;  %v5496_v13 = vpop.permute.xlu0 %1384  ;;  %vm1469_vm13 = vcmp.eq.s32.totalorder %v5321_v15, %v4973_v43 }
 0x107   :  { %4309 = vmatmul.mubr.msk.f32.gmra.mxu0 %vm641_vm1, %v3739_v16  ;;  %vm1471_vm15 = vcmp.eq.s32.totalorder %v5496_v13, %v4973_v43 }
 0x108   :  { %4311 = vmatprep.mubr.msk.f32.mxu0 %vm641_vm1, %v3740_v41  ;;  %v3816_v13 = vsel %vm1471_vm15, 1.0, %v6562_v25 }
 0x109   :  { %v5333_v47 = vpop.permute.xlu1 %1381 }
 0x10a   :  { %4623 = vset.pattern.permute.xlu1 %v4669_v29  ;;  %2666 = vperm.xlu0 %4642, %v4820_v20   ;;  %v5501_v33 = vpop.permute.xlu0 %1390  ;;  %vm1470_vm14 = vcmp.eq.s32.totalorder %v5333_v47, %v4973_v43  ;;  %v2548_v47 = vld [vmem:[%s6510_s2 + $0x40] sm:$0xff] }
 0x10b   :  { %4312 = vmatmul.mubr.msk.f32.gmra.mxu0 %vm641_vm1, %v3741_v28  ;;  %2660 = vperm.xlu1 %4623, %v4808_v18  }
 0x10c   :  { %4314 = vmatprep.mubr.msk.f32.mxu0 %vm641_vm1, %v3742_v17 }
 0x10d   :  { %v5349_v45 = vpop.permute.xlu1 %1387 }
 0x10e   :  { %2675 = vperm.xlu0 %4642, %v4827_v21   ;;  %vm1472_vm4 = vcmp.eq.s32.totalorder %v5349_v45, %v4973_v43 }
 0x10f   :  { %4315 = vmatmul.mubr.msk.f32.gmra.mxu0 %vm641_vm1, %v3743_v31  ;;  %4624 = vset.pattern.permute.xlu1 %v6563_v53  ;;  %v3817_v45 = vsel %vm1472_vm4, 1.0, %v6562_v25 }
 0x110   :  { %4325 = vmatprep.mubr.msk.f32.mxu0 %vm641_vm1, %v3676_v46  ;;  %2034 = vperm.xlu1 %4624, %v4820_v20   ;;  %v1917_v20 = vld [vmem:[%s6510_s2 + $0x38] sm:$0xff] }
 0x111   :  { %v5360_v18 = vpop.permute.xlu1 %1393 }
 0x112   :  { %2678 = vperm.xlu0 %4642, %v4844_v24   ;;  %vm1474_vm8 = vcmp.eq.s32.totalorder %v5360_v18, %v4973_v43 }
 0x113   :  { %4326 = vmatmul.mubr.msk.f32.vlgmr.msra.gmra.mxu0 %vm641_vm1, %v3677_v50 }
 0x114   :  { %4328 = vmatprep.mubr.msk.f32.mxu0 %vm641_vm1, %v3678_v62  ;;  %4374 = vmatpush3.msra.mxu0 %v5162_v56  ;;  %v6569_v56 = vld [vmem:[#allocation16_spill] sm:$0xff]  ;;  %v4655_v62 = vld [vmem:[%s6512_s0 + $0xb8] sm:$0xff] }
 0x115   :  { %4375 = vmatprep.subr.mxu0 %v1284_v27  ;;  %2037 = vperm.xlu1 %4624, %v6566_v48   ;;  %v5378_v34 = vpop.permute.xlu1 %1399  ;;  %vm272_vm5 = vcmp.eq.s32.totalorder %v6569_v56, %v4973_v43 }
 0x116   :  { %4376 = vmatpush3.msra.mxu0 %v1284_v27  ;;  %2687 = vperm.xlu0 %4642, %v6567_v23   ;;  %v3682_v52 = vsel %vm272_vm5, 1.0, %v6562_v25  ;;  %vm1473_vm5 = vcmp.eq.s32.totalorder %v5501_v33, %v4973_v43 }
 0x117   :  { %4329 = vmatmul.mubr.msk.f32.gmra.mxu0 %vm641_vm1, %v3679_v61  ;;  %4439 = vmatprep.subr.mxu0 %v1917_v20  ;;  %v4656_v61 = vld [vmem:[%s6512_s0 + $0xc8] sm:$0xff]  ;;  %v3818_v33 = vsel %vm1473_vm5, 1.0, %v6562_v25 }
 0x118   :  { %4331 = vmatprep.mubr.msk.f32.mxu0 %vm641_vm1, %v3680_v0  ;;  %v4657_v0 = vld [vmem:[%s6512_s0 + $0xc0] sm:$0xff] }
 0x119   :  { %4625 = vset.pattern.permute.xlu1 %v4669_v29  ;;  %v5390_v51 = vpop.permute.xlu1 %1405 }
 0x11a   :  { %2669 = vperm.xlu1 %4625, %v6566_v48   ;;  %2690 = vperm.xlu0 %4642, %v6570_v63  }
 0x11b   :  { %4332 = vmatmul.mubr.msk.f32.gmra.mxu0 %vm641_vm1, %v3681_v38  ;;  %v4658_v38 = vld [vmem:[%s6512_s0 + $0xd0] sm:$0xff] }
 0x11c   :  { %4334 = vmatprep.mubr.msk.f32.mxu0 %vm641_vm1, %v3682_v52 }
 0x11d   :  { %v5402_v40 = vpop.permute.xlu1 %1411 }
 0x11e   :  { %4626 = vset.pattern.permute.xlu1 %v6563_v53  ;;  %2699 = vperm.xlu0 %4642, %v6572_v14  }
 0x11f   :  { %4335 = vmatmul.mubr.msk.f32.gmra.mxu0 %vm641_vm1, %v3683_v58  ;;  %2043 = vperm.xlu1 %4626, %v4827_v21  }
 0x120   :  { %4337 = vmatprep.mubr.msk.f32.mxu0 %vm641_vm1, %v3684_v1 }
 0x121   :  { %v5415_v37 = vpop.permute.xlu1 %1417 }
 0x122   :  { %2702 = vperm.xlu0 %4642, %v6573_v4  }
 0x123   :  { %4338 = vmatmul.mubr.msk.f32.gmra.mxu0 %vm641_vm1, %v3685_v54  ;;  %4627 = vset.pattern.permute.xlu1 %v4669_v29 }
 0x124   :  { %4340 = vmatprep.mubr.msk.f32.mxu0 %vm641_vm1, %v3686_v11  ;;  %2672 = vperm.xlu1 %4627, %v4832_v22   ;;  %v4660_v11 = vld [vmem:[%s6512_s0 + $0xe8] sm:$0xff] }
 0x125   :  { %v5426_v21 = vpop.permute.xlu1 %1423 }
 0x126   :  { %6574 = vst [vmem:[#allocation13_spill] sm:$0xff] %v5426_v21  ;;  %2711 = vperm.xlu0 %4642, %v6575_v32  }
 0x127   :  { %4341 = vmatmul.mubr.msk.f32.gmra.mxu0 %vm641_vm1, %v3687_v39  ;;  %v4661_v39 = vld [vmem:[%s6512_s0 + $0xe0] sm:$0xff] }
 0x128   :  { %4377 = vmatprep.mubr.msk.f32.mxu0 %vm72_vm0, %v5434_v44  ;;  %4628 = vset.pattern.permute.xlu1 %v6563_v53 }
 0x129   :  { %2046 = vperm.xlu1 %4628, %v4844_v24   ;;  %v5440_v22 = vpop.permute.xlu1 %1429  ;;  %v5456_v24 = vld [vmem:[%s6511_s1 + $0x10] sm:$0xff] }
 0x12a   :  { %6577 = vst [vmem:[#allocation2_spill] sm:$0xff] %v5440_v22  ;;  %2714 = vperm.xlu0 %4642, %v6578_v3   ;;  %6580 = vst [vmem:[#allocation15_spill] sm:$0xff] %v5456_v24 }
 0x12b   :  { %4378 = vmatmul.mubr.msk.f32.vlgmr.msra.gmra.mxu0 %vm72_vm0, %v5449_v57 }
 0x12c   :  { %4380 = vmatprep.mubr.msk.f32.mxu0 %vm72_vm0, %v5456_v24  ;;  %4440 = vmatpush3.msra.mxu0 %v1917_v20 }
 0x12d   :  { %4441 = vmatprep.subr.mxu0 %v1916_v19  ;;  %2049 = vperm.xlu1 %4628, %v6581_v6   ;;  %v5461_v8 = vpop.permute.xlu1 %1435 }
 0x12e   :  { %6582 = vst [vmem:[#allocation16_spill] sm:$0xff] %v5461_v8  ;;  %4442 = vmatpush3.msra.mxu0 %v1916_v19  ;;  %2723 = vperm.xlu0 %4642, %v6583_v60   ;;  %v4662_v19 = vld [vmem:[%s6512_s0 + $0xf0] sm:$0xff] }
 0x12f   :  { %4381 = vmatmul.mubr.msk.f32.gmra.mxu0 %vm72_vm0, %v5467_v5 }
 0x130   :  { %4443 = vmatprep.mubr.msk.f32.mxu0 %vm72_vm0, %v5434_v44 }
 0x131   :  { %4629 = vset.pattern.permute.xlu1 %v4669_v29  ;;  %v5474_v7 = vpop.permute.xlu1 %1441 }
 0x132   :  { %6585 = vst [vmem:[#allocation17_spill] sm:$0xff] %v5474_v7  ;;  %2681 = vperm.xlu1 %4629, %v6581_v6   ;;  %2726 = vperm.xlu0 %4642, %v6586_v49   ;;  %v4663_v6 = vld [vmem:[%s6512_s0 + $0xf8] sm:$0xff] }
 0x133   :  { %4444 = vmatmul.mubr.msk.f32.vlgmr.msra.gmra.mxu0 %vm72_vm0, %v5449_v57 }
 0x134   :  { %4446 = vmatprep.mubr.msk.f32.mxu0 %vm72_vm0, %v5456_v24 }
 0x135   :  { %v5483_v35 = vpop.permute.xlu1 %1447 }
 0x136   :  { %4630 = vset.pattern.permute.xlu1 %v6563_v53  ;;  %6587 = vst [vmem:[#allocation7_spill] sm:$0xff] %v5483_v35 }
 0x137   :  { %4447 = vmatmul.mubr.msk.f32.gmra.mxu0 %vm72_vm0, %v5467_v5  ;;  %2055 = vperm.xlu1 %4630, %v6567_v23  }
 0x139   :  { %v5490_v12 = vpop.permute.xlu1 %1453 }
 0x13a   :  { %6588 = vst [vmem:[#allocation8_spill] sm:$0xff] %v5490_v12 }
 0x13b   :  { %4631 = vset.pattern.permute.xlu1 %v4669_v29 }
 0x13c   :  { %2684 = vperm.xlu1 %4631, %v4856_v26   ;;  %v5506_v26 = vpop.permute.xlu0 %1396 }
 0x13d   :  { %v5498_v10 = vpop.permute.xlu1 %1459  ;;  %vm1475_vm9 = vcmp.eq.s32.totalorder %v5506_v26, %v4973_v43 }
 0x13e   :  { %6589 = vst [vmem:[#allocation9_spill] sm:$0xff] %v5498_v10  ;;  %v3820_v26 = vsel %vm1475_vm9, 1.0, %v6562_v25 }
 0x140   :  { %4632 = vset.pattern.permute.xlu1 %v6563_v53  ;;  %v5509_v41 = vpop.permute.xlu0 %1402 }
 0x141   :  { %2058 = vperm.xlu1 %4632, %v6570_v63   ;;  %v5503_v16 = vpop.permute.xlu1 %1465 }
 0x142   :  { %6591 = vst [vmem:[#allocation10_spill] sm:$0xff] %v5503_v16 }
 0x144   :  { %v5515_v17 = vpop.permute.xlu0 %1408 }
 0x145   :  { %2061 = vperm.xlu1 %4632, %v6590_v42  }
 0x146   :  { %v5512_v28 = vpop.permute.xlu1 %2007 }
 0x147   :  { %vm2100_vm2 = vcmp.eq.s32.totalorder %v5512_v28, %v4973_v43 }
 0x148   :  { %v5521_v31 = vpop.permute.xlu0 %1414 }
 0x149   :  { %4633 = vset.pattern.permute.xlu1 %v4669_v29 }
 0x14a   :  { %2693 = vperm.xlu1 %4633, %v6590_v42  }
 0x14c   :  { %v5525_v50 = vpop.permute.xlu0 %1420 }
 0x14e   :  { %4634 = vset.pattern.permute.xlu1 %v6563_v53 }
 0x14f   :  { %2067 = vperm.xlu1 %4634, %v6572_v14  }
 0x150   :  { %v5532_v9 = vpop.permute.xlu0 %1426 }
 0x151   :  { %6593 = vst [vmem:[#allocation11_spill] sm:$0xff] %v5532_v9 }
 0x153   :  { %4635 = vset.pattern.permute.xlu1 %v4669_v29 }
 0x154   :  { %2696 = vperm.xlu1 %4635, %v4880_v30   ;;  %v5519_v46 = vpop.permute.xlu1 %2636  ;;  %v5537_v36 = vpop.permute.xlu0 %1432 }
 0x155   :  { %6592 = vst [vmem:[#allocation3_spill] sm:$0xff] %v5519_v46  ;;  %6594 = vst [vmem:[#allocation12_spill] sm:$0xff] %v5537_v36 }
 0x158   :  { %4636 = vset.pattern.permute.xlu1 %v6563_v53  ;;  %v5539_v20 = vpop.permute.xlu0 %1438 }
 0x159   :  { %2070 = vperm.xlu1 %4636, %v6573_v4   ;;  %v5527_v27 = vpop.permute.xlu1 %2010  ;;  %6595 = vst [vmem:[#allocation5_spill] sm:$0xff] %v5539_v20 }
 0x15a   :  { %vm2101_vm3 = vcmp.eq.s32.totalorder %v5527_v27, %v4973_v43 }
 0x15c   :  { %v5547_v23 = vpop.permute.xlu0 %1444 }
 0x15d   :  { %2073 = vperm.xlu1 %4636, %v4655_v62   ;;  %v5534_v30 = vpop.permute.xlu1 %2013  ;;  %6597 = vst [vmem:[#allocation19_spill] sm:$0xff] %v5547_v23 }
 0x15e   :  { %vm2102_vm6 = vcmp.eq.s32.totalorder %v5534_v30, %v4973_v43  ;;  %v3819_v30 = vsel %vm1474_vm8, 1.0, %v6562_v25 }
 0x160   :  { %v5555_v56 = vpop.permute.xlu0 %1450 }
 0x161   :  { %4637 = vset.pattern.permute.xlu1 %v4669_v29  ;;  %6598 = vst [vmem:[#allocation20_spill] sm:$0xff] %v5555_v56 }
 0x162   :  { %2705 = vperm.xlu1 %4637, %v4655_v62  }
 0x163   :  { %v5542_v48 = vpop.permute.xlu1 %2645 }
 0x164   :  { %6596 = vst [vmem:[#allocation18_spill] sm:$0xff] %v5542_v48  ;;  %v5563_v52 = vpop.permute.xlu0 %1456 }
 0x165   :  { %6600 = vst [vmem:[#allocation22_spill] sm:$0xff] %v5563_v52 }
 0x166   :  { %4638 = vset.pattern.permute.xlu1 %v6563_v53 }
 0x167   :  { %2079 = vperm.xlu1 %4638, %v4656_v61  }
 0x168   :  { %v5553_v55 = vpop.permute.xlu1 %2019  ;;  %v5570_v14 = vpop.permute.xlu0 %1462 }
 0x169   :  { %6601 = vst [vmem:[#allocation23_spill] sm:$0xff] %v5570_v14  ;;  %vm2104_vm10 = vcmp.eq.s32.totalorder %v5553_v55, %v4973_v43 }
 0x16a   :  { %v3885_v55 = vsel %vm2104_vm10, 1.0, %v6562_v25  ;;  %vm1482_vm10 = vcmp.eq.s32.totalorder %v5415_v37, %v4973_v43 }
 0x16b   :  { %4639 = vset.pattern.permute.xlu1 %v4669_v29 }
 0x16c   :  { %2708 = vperm.xlu1 %4639, %v4657_v0   ;;  %v2005_v1 = vpop.permute.xlu0 %2004 }
 0x16d   :  { %v5561_v63 = vpop.permute.xlu1 %2648  ;;  %vm2099_vm11 = vcmp.eq.s32.totalorder %v2005_v1, %v4973_v43 }
 0x16e   :  { %6599 = vst [vmem:[#allocation21_spill] sm:$0xff] %v5561_v63  ;;  %v3880_v4 = vsel %vm2099_vm11, 1.0, %v6562_v25 }
 0x16f   :  { %4457 = vmatprep.mubr.msk.f32.mxu0 %vm641_vm1, %v3880_v4 }
 0x170   :  { %4640 = vset.pattern.permute.xlu1 %v6563_v53  ;;  %v2017_v28 = vpop.permute.xlu0 %2016 }
 0x171   :  { %2082 = vperm.xlu1 %4640, %v4658_v38   ;;  %vm2103_vm7 = vcmp.eq.s32.totalorder %v2017_v28, %v4973_v43 }
 0x172   :  { %v3884_v18 = vsel %vm2103_vm7, 1.0, %v6562_v25  ;;  %vm1481_vm7 = vcmp.eq.s32.totalorder %v5521_v31, %v4973_v43 }
 0x173   :  { %v5568_v58 = vpop.permute.xlu1 %2022  ;;  %v3826_v31 = vsel %vm1481_vm7, 1.0, %v6562_v25 }
 0x174   :  { %vm2105_vm11 = vcmp.eq.s32.totalorder %v5568_v58, %v4973_v43 }
 0x175   :  { %2085 = vperm.xlu1 %4640, %v4659_v2   ;;  %v3886_v58 = vsel %vm2105_vm11, 1.0, %v6562_v25  ;;  %vm1483_vm11 = vcmp.eq.s32.totalorder %v5525_v50, %v4973_v43 }
 0x177   :  { %v5575_v54 = vpop.permute.xlu1 %2025 }
 0x179   :  { %4641 = vset.pattern.permute.xlu1 %v4669_v29 }
 0x17a   :  { %2717 = vperm.xlu1 %4641, %v4659_v2  }
 0x17c   :  { %v5586_v32 = vpop.permute.xlu1 %2657 }
 0x17d   :  { %6602 = vst [vmem:[#allocation24_spill] sm:$0xff] %v5586_v32 }
 0x17e   :  { %4643 = vset.pattern.permute.xlu1 %v6563_v53 }
 0x17f   :  { %2091 = vperm.xlu1 %4643, %v4660_v11  }
 0x181   :  { %v5592_v3 = vpop.permute.xlu1 %2031 }
 0x182   :  { %vm2108_vm4 = vcmp.eq.s32.totalorder %v5592_v3, %v4973_v43 }
 0x183   :  { %4644 = vset.pattern.permute.xlu1 %v4669_v29 }
 0x184   :  { %2720 = vperm.xlu1 %4644, %v4661_v39  }
 0x186   :  { %v5597_v60 = vpop.permute.xlu1 %2660 }
 0x187   :  { %6603 = vst [vmem:[#allocation25_spill] sm:$0xff] %v5597_v60 }
 0x188   :  { %4645 = vset.pattern.permute.xlu1 %v6563_v53 }
 0x189   :  { %2094 = vperm.xlu1 %4645, %v4662_v19  }
 0x18b   :  { %v5604_v42 = vpop.permute.xlu1 %2034 }
 0x18c   :  { %vm2109_vm5 = vcmp.eq.s32.totalorder %v5604_v42, %v4973_v43 }
 0x18d   :  { %2097 = vperm.xlu1 %4645, %v4663_v6   ;;  %v3890_v3 = vsel %vm2109_vm5, 1.0, %v6562_v25 }
 0x190   :  { %v5612_v2 = vpop.permute.xlu1 %2037 }
 0x191   :  { %4646 = vset.pattern.permute.xlu1 %v4669_v29  ;;  %vm2110_vm8 = vcmp.eq.s32.totalorder %v5612_v2, %v4973_v43  ;;  %v3827_v2 = vsel %vm1482_vm10, 1.0, %v6562_v25 }
 0x192   :  { %2729 = vperm.xlu1 %4646, %v4663_v6  }
 0x193   :  { %v5600_v49 = vpop.f32.mrf.mxu0 }
 0x195   :  { %v5602_v53 = vpop.f32.mrf.mxu0  ;;  %v5620_v19 = vpop.permute.xlu1 %2669 }
 0x196   :  { %6604 = vst [vmem:[#allocation26_spill] sm:$0xff] %v5620_v19 }
 0x197   :  { %v5606_v62 = vpop.f32.mrf.mxu0 }
 0x199   :  { %v5608_v61 = vpop.f32.mrf.mxu0 }
 0x19a   :  { %v5628_v24 = vpop.permute.xlu1 %2043 }
 0x19b   :  { %v5610_v0 = vpop.f32.mrf.mxu0 }
 0x19c   :  { %v4345_v38 = vpop.f32.mrf.mxu1 }
 0x19d   :  { %v5614_v1 = vpop.f32.mrf.mxu0 }
 0x19e   :  { %v1185_v4 = vpop.f32.mrf.mxu1 }
 0x19f   :  { %v5616_v29 = vpop.f32.mrf.mxu0  ;;  %v5636_v12 = vpop.permute.xlu1 %2672 }
 0x1a0   :  { %6607 = vst [vmem:[#allocation29_spill] sm:$0xff] %v5636_v12 }
 0x1a1   :  { %v5618_v11 = vpop.f32.mrf.mxu0  ;;  %v4348_v39 = vpop.f32.mrf.mxu1 }
 0x1a3   :  { %v5622_v6 = vpop.f32.mrf.mxu0  ;;  %v1195_v60 = vpop.f32.mrf.mxu1 }
 0x1a5   :  { %v5624_v32 = vpop.f32.mrf.mxu0  ;;  %v4351_v63 = vpop.f32.mrf.mxu1 }
 0x1a7   :  { %v5626_v48 = vpop.f32.mrf.mxu0  ;;  %v1205_v5 = vpop.f32.mrf.mxu1 }
 0x1a9   :  { %v5630_v57 = vpop.f32.mrf.mxu0  ;;  %v4354_v46 = vpop.f32.mrf.mxu1 }
 0x1ab   :  { %v4289_v44 = vpop.f32.mrf.mxu0  ;;  %v1215_v16 = vpop.f32.mrf.mxu1 }
 0x1ac   :  { %v5632_v14 = vadd.f32 %v4345_v38, %v4289_v44  ;;  %v5644_v44 = vpop.permute.xlu1 %2046 }
 0x1ad   :  { %v864_v10 = vpop.f32.mrf.mxu0  ;;  %v4357_v19 = vpop.f32.mrf.mxu1 }
 0x1ae   :  { %6605 = vst [vmem:[#allocation27_spill] sm:$0xff] %v5632_v14  ;;  %v5634_v52 = vadd.f32 %v1185_v4, %v864_v10 }
 0x1af   :  { %v4292_v56 = vpop.f32.mrf.mxu0  ;;  %v1225_v35 = vpop.f32.mrf.mxu1 }
 0x1b0   :  { %6606 = vst [vmem:[#allocation28_spill] sm:$0xff] %v5634_v52  ;;  %v5638_v23 = vadd.f32 %v4348_v39, %v4292_v56 }
 0x1b1   :  { %v874_v7 = vpop.f32.mrf.mxu0  ;;  %v4360_v20 = vpop.f32.mrf.mxu1 }
 0x1b2   :  { %6608 = vst [vmem:[#allocation30_spill] sm:$0xff] %v5638_v23  ;;  %v5640_v8 = vadd.f32 %v1195_v60, %v874_v7  ;;  %v5652_v23 = vpop.permute.xlu1 %2049 }
 0x1b3   :  { %v4295_v36 = vpop.f32.mrf.mxu0  ;;  %v1235_v22 = vpop.f32.mrf.mxu1 }
 0x1b4   :  { %6609 = vst [vmem:[#allocation31_spill] sm:$0xff] %v5640_v8  ;;  %v5642_v9 = vadd.f32 %v4351_v63, %v4295_v36 }
 0x1b5   :  { %v884_v38 = vpop.f32.mrf.mxu0  ;;  %v4363_v14 = vpop.f32.mrf.mxu1 }
 0x1b6   :  { %6610 = vst [vmem:[#allocation32_spill] sm:$0xff] %v5642_v9  ;;  %v5646_v10 = vadd.f32 %v1205_v5, %v884_v38  ;;  %v5660_v5 = vpop.permute.xlu1 %2681 }
 0x1b7   :  { %v4298_v4 = vpop.f32.mrf.mxu0  ;;  %v1245_v56 = vpop.f32.mrf.mxu1  ;;  %6615 = vst [vmem:[#allocation37_spill] sm:$0xff] %v5660_v5 }
 0x1b8   :  { %v5648_v12 = vadd.f32 %v4354_v46, %v4298_v4 }
 0x1b9   :  { %v894_v52 = vpop.f32.mrf.mxu0  ;;  %v4366_v63 = vpop.f32.mrf.mxu1 }
 0x1ba   :  { %6611 = vst [vmem:[#allocation33_spill] sm:$0xff] %v5648_v12  ;;  %v5650_v39 = vadd.f32 %v1215_v16, %v894_v52 }
 0x1bb   :  { %v4301_v7 = vpop.f32.mrf.mxu0  ;;  %v1255_v38 = vpop.f32.mrf.mxu1 }
 0x1bc   :  { %6612 = vst [vmem:[#allocation34_spill] sm:$0xff] %v5650_v39  ;;  %v5654_v60 = vadd.f32 %v4357_v19, %v4301_v7  ;;  %v5668_v7 = vpop.permute.xlu1 %2055 }
 0x1bd   :  { %v904_v36 = vpop.f32.mrf.mxu0  ;;  %v4369_v12 = vpop.f32.mrf.mxu1 }
 0x1be   :  { %v5656_v9 = vadd.f32 %v1225_v35, %v904_v36 }
 0x1bf   :  { %v4304_v8 = vpop.f32.mrf.mxu0 }
 0x1c0   :  { %6613 = vst [vmem:[#allocation35_spill] sm:$0xff] %v5656_v9  ;;  %v5658_v21 = vadd.f32 %v4360_v20, %v4304_v8  ;;  %v1265_v20 = vpop.f32.mrf.mxu1 }
 0x1c1   :  { %v914_v46 = vpop.f32.mrf.mxu0 }
 0x1c2   :  { %6614 = vst [vmem:[#allocation36_spill] sm:$0xff] %v5658_v21  ;;  %v5662_v4 = vadd.f32 %v1235_v22, %v914_v46  ;;  %v5676_v22 = vpop.permute.xlu1 %2684  ;;  %v4372_v46 = vpop.f32.mrf.mxu1 }
 0x1c3   :  { %v4307_v16 = vpop.f32.mrf.mxu0  ;;  %6618 = vst [vmem:[#allocation40_spill] sm:$0xff] %v5676_v22 }
 0x1c4   :  { %v5664_v52 = vadd.f32 %v4363_v14, %v4307_v16 }
 0x1c5   :  { %v924_v39 = vpop.f32.mrf.mxu0 }
 0x1c6   :  { %v5666_v19 = vadd.f32 %v1245_v56, %v924_v39 }
 0x1c7   :  { %v4310_v35 = vpop.f32.mrf.mxu0 }
 0x1c8   :  { %6616 = vst [vmem:[#allocation38_spill] sm:$0xff] %v5666_v19  ;;  %v5670_v36 = vadd.f32 %v4366_v63, %v4310_v35  ;;  %v5684_v35 = vpop.permute.xlu1 %2058 }
 0x1c9   :  { %v934_v8 = vpop.f32.mrf.mxu0  ;;  %vm2117_vm7 = vcmp.eq.s32.totalorder %v5684_v35, %v4973_v43 }
 0x1ca   :  { %v5672_v21 = vadd.f32 %v1255_v38, %v934_v8  ;;  %v3898_v35 = vsel %vm2117_vm7, 1.0, %v6562_v25 }
 0x1cb   :  { %v4313_v5 = vpop.f32.mrf.mxu0 }
 0x1cc   :  { %v5674_v9 = vadd.f32 %v4369_v12, %v4313_v5 }
 0x1cd   :  { %v944_v14 = vpop.f32.mrf.mxu0 }
 0x1ce   :  { %6617 = vst [vmem:[#allocation39_spill] sm:$0xff] %v5674_v9  ;;  %v5678_v16 = vadd.f32 %v1265_v20, %v944_v14  ;;  %v5695_v14 = vpop.permute.xlu1 %2061 }
 0x1cf   :  { %v4316_v56 = vpop.f32.mrf.mxu0  ;;  %vm2118_vm10 = vcmp.eq.s32.totalorder %v5695_v14, %v4973_v43 }
 0x1d0   :  { %6619 = vst [vmem:[#allocation41_spill] sm:$0xff] %v5678_v16  ;;  %v5680_v39 = vadd.f32 %v4372_v46, %v4316_v56 }
 0x1d1   :  { %v5682_v19 = vpop.f32.mrf.mxu0 }
 0x1d2   :  { %6620 = vst [vmem:[#allocation42_spill] sm:$0xff] %v5680_v39  ;;  %6621 = vst [vmem:[#allocation43_spill] sm:$0xff] %v5682_v19 }
 0x1d3   :  { %v4327_v63 = vpop.f32.mrf.mxu0 }
 0x1d4   :  { %v5687_v38 = vadd.f32 %v4327_v63, %v5600_v49 }
 0x1d5   :  { %v1125_v8 = vpop.f32.mrf.mxu0 }
 0x1d6   :  { %v5690_v12 = vadd.f32 %v1125_v8, %v5602_v53  ;;  %v5706_v8 = vpop.permute.xlu1 %2693 }
 0x1d7   :  { %v4330_v5 = vpop.f32.mrf.mxu0  ;;  %6622 = vst [vmem:[#allocation44_spill] sm:$0xff] %v5706_v8 }
 0x1d8   :  { %v5693_v22 = vadd.f32 %v4330_v5, %v5606_v62 }
 0x1d9   :  { %v1135_v20 = vpop.f32.mrf.mxu0 }
 0x1da   :  { %v5698_v46 = vadd.f32 %v1135_v20, %v5608_v61 }
 0x1db   :  { %v4333_v56 = vpop.f32.mrf.mxu0 }
 0x1dc   :  { %v5701_v39 = vadd.f32 %v4333_v56, %v5610_v0  ;;  %v5717_v56 = vpop.permute.xlu1 %2067 }
 0x1dd   :  { %v1145_v49 = vpop.f32.mrf.mxu0 }
 0x1de   :  { %v5704_v63 = vadd.f32 %v1145_v49, %v5614_v1 }
 0x1df   :  { %v4336_v53 = vpop.f32.mrf.mxu0 }
 0x1e0   :  { %v5709_v62 = vadd.f32 %v4336_v53, %v5616_v29 }
 0x1e1   :  { %v1155_v5 = vpop.f32.mrf.mxu0 }
 0x1e2   :  { %v5712_v19 = vadd.f32 %v1155_v5, %v5618_v11  ;;  %v5728_v5 = vpop.permute.xlu1 %2696 }
 0x1e3   :  { %v4339_v61 = vpop.f32.mrf.mxu0 }
 0x1e4   :  { %v5715_v20 = vadd.f32 %v4339_v61, %v5622_v6 }
 0x1e5   :  { %v1165_v0 = vpop.f32.mrf.mxu0 }
 0x1e6   :  { %v5720_v1 = vadd.f32 %v1165_v0, %v5624_v32  ;;  %v5730_v9 = vpop.permute.xlu1 %2070 }
 0x1e7   :  { %v4342_v49 = vpop.f32.mrf.mxu0 }
 0x1e8   :  { %v5723_v8 = vadd.f32 %v4342_v49, %v5626_v48 }
 0x1e9   :  { %v1175_v29 = vpop.f32.mrf.mxu0 }
 0x1ea   :  { %v5726_v53 = vadd.f32 %v1175_v29, %v5630_v57  ;;  %v3813_v57 = vsel %vm1468_vm12, 1.0, %v6562_v25  ;;  %v5737_v49 = vpop.permute.xlu1 %2073  ;;  %v3814_v29 = vsel %vm1469_vm13, 1.0, %v6562_v25  ;;  %vm1476_vm12 = vcmp.eq.s32.totalorder %v5378_v34, %v4973_v43 }
 0x1eb   :  { %v4379_v11 = vpop.f32.mrf.mxu0  ;;  %vm1477_vm13 = vcmp.eq.s32.totalorder %v5509_v41, %v4973_v43  ;;  %v3821_v34 = vsel %vm1476_vm12, 1.0, %v6562_v25  ;;  %vm2112_vm12 = vcmp.eq.s32.totalorder %v5628_v24, %v4973_v43  ;;  %v6624_v24 = vld [vmem:[#allocation11_spill] sm:$0xff] }
 0x1ed   :  { %v1352_v16 = vpop.f32.mrf.mxu0 }
 0x1ee   :  { %v5765_v27 = vpop.permute.xlu1 %2705 }
 0x1ef   :  { %v4382_v6 = vpop.f32.mrf.mxu0 }
 0x1f0   :  { %4383 = vmatprep.subr.mxu1 %v4382_v6 }
 0x1f1   :  { %v1362_v61 = vpop.f32.mrf.mxu0  ;;  %4384 = vmatpush3.msra.mxu1 %v4382_v6  ;;  %v3882_v6 = vsel %vm2101_vm3, 1.0, %v6562_v25  ;;  %vm1479_vm3 = vcmp.eq.s32.totalorder %v5515_v17, %v4973_v43 }
 0x1f2   :  { %4385 = vmatprep.subr.mxu1 %v1362_v61  ;;  %v3824_v17 = vsel %vm1479_vm3, 1.0, %v6562_v25 }
 0x1f3   :  { %4386 = vmatpush3.msra.mxu1 %v1362_v61  ;;  %v4445_v48 = vpop.f32.mrf.mxu0  ;;  %v3883_v61 = vsel %vm2102_vm6, 1.0, %v6562_v25  ;;  %vm1480_vm6 = vcmp.eq.s32.totalorder %v5402_v40, %v4973_v43 }
 0x1f4   :  { %4387 = vmatprep.subr.mxu1 %v4379_v11  ;;  %v3825_v40 = vsel %vm1480_vm6, 1.0, %v6562_v25  ;;  %vm2116_vm6 = vcmp.eq.s32.totalorder %v5668_v7, %v4973_v43  ;;  %v6628_v7 = vld [vmem:[#allocation5_spill] sm:$0xff] }
 0x1f5   :  { %4388 = vmatpush3.msra.mxu1 %v4379_v11  ;;  %v1984_v32 = vpop.f32.mrf.mxu0  ;;  %v3881_v11 = vsel %vm2100_vm2, 1.0, %v6562_v25  ;;  %vm1478_vm2 = vcmp.eq.s32.totalorder %v5390_v51, %v4973_v43 }
 0x1f6   :  { %4389 = vmatprep.subr.mxu1 %v1352_v16 }
 0x1f7   :  { %4390 = vmatpush3.msra.mxu1 %v1352_v16  ;;  %v4448_v0 = vpop.f32.mrf.mxu0  ;;  %v3815_v16 = vsel %vm1470_vm14, 1.0, %v6562_v25  ;;  %vm2106_vm14 = vcmp.eq.s32.totalorder %v5575_v54, %v4973_v43 }
 0x1f8   :  { %4392 = vmatmul.mubr.msk.f32.vlgmr.msra.gmra.mxu1 %vm641_vm1, %v3813_v57  ;;  %4449 = vmatprep.subr.mxu0 %v4448_v0  ;;  %v2029_v57 = vpop.permute.xlu0 %2028  ;;  %v3887_v41 = vsel %vm2106_vm14, 1.0, %v6562_v25 }
 0x1f9   :  { %v1994_v15 = vpop.f32.mrf.mxu0  ;;  %4450 = vmatpush3.msra.mxu0 %v4448_v0  ;;  %4394 = vmatprep.mubr.msk.f32.mxu1 %vm641_vm1, %v3814_v29  ;;  %vm2107_vm15 = vcmp.eq.s32.totalorder %v2029_v57, %v4973_v43  ;;  %v3823_v0 = vsel %vm1478_vm2, 1.0, %v6562_v25  ;;  %v3889_v29 = vsel %vm2108_vm4, 1.0, %v6562_v25  ;;  %vm2114_vm2 = vcmp.eq.s32.totalorder %v5652_v23, %v4973_v43 }
 0x1fa   :  { %4451 = vmatprep.subr.mxu0 %v1994_v15  ;;  %4505 = vmatprep.subr.mxu1 %v2549_v59  ;;  %v3888_v51 = vsel %vm2107_vm15, 1.0, %v6562_v25  ;;  %vm1485_vm15 = vcmp.eq.s32.totalorder %v6624_v24, %v4973_v43  ;;  %v6635_v24 = vld [vmem:[#allocation9_spill] sm:$0xff] }
 0x1fb   :  { %4452 = vmatpush3.msra.mxu0 %v1994_v15  ;;  %4506 = vmatpush3.msra.mxu1 %v2549_v59  ;;  %v3891_v15 = vsel %vm2110_vm8, 1.0, %v6562_v25 }
 0x1fc   :  { %4395 = vmatmul.mubr.msk.f32.gmra.mxu1 %vm641_vm1, %v3815_v16  ;;  %4453 = vmatprep.subr.mxu0 %v4445_v48  ;;  %v2041_v59 = vpop.permute.xlu0 %2040  ;;  %v6623_v16 = vld [vmem:[#allocation13_spill] sm:$0xff] }
 0x1fd   :  { %4454 = vmatpush3.msra.mxu0 %v4445_v48  ;;  %4397 = vmatprep.mubr.msk.f32.mxu1 %vm641_vm1, %v3816_v13  ;;  %v5788_v48 = vpop.permute.xlu1 %2079  ;;  %vm2111_vm9 = vcmp.eq.s32.totalorder %v2041_v59, %v4973_v43  ;;  %vm1484_vm14 = vcmp.eq.s32.totalorder %v6623_v16, %v4973_v43  ;;  %v3893_v13 = vsel %vm2112_vm12, 1.0, %v6562_v25 }
 0x1fe   :  { %4455 = vmatprep.subr.mxu0 %v1984_v32  ;;  %4507 = vmatprep.subr.mxu1 %v2548_v47  ;;  %v3892_v37 = vsel %vm2111_vm9, 1.0, %v6562_v25  ;;  %vm1489_vm9 = vcmp.eq.s32.totalorder %v6628_v7, %v4973_v43  ;;  %v6638_v7 = vld [vmem:[#allocation14_spill] sm:$0xff] }
 0x1ff   :  { %4456 = vmatpush3.msra.mxu0 %v1984_v32  ;;  %4508 = vmatpush3.msra.mxu1 %v2548_v47  ;;  %v3822_v32 = vsel %vm1477_vm13, 1.0, %v6562_v25  ;;  %vm2113_vm13 = vcmp.eq.s32.totalorder %v5644_v44, %v4973_v43  ;;  %v3828_v47 = vsel %vm1483_vm11, 1.0, %v6562_v25 }
 0x200   :  { %4398 = vmatmul.mubr.msk.f32.gmra.mxu1 %vm641_vm1, %v3817_v45  ;;  %4458 = vmatmul.mubr.msk.f32.vlgmr.msra.gmra.mxu0 %vm641_vm1, %v3881_v11  ;;  %v2053_v50 = vpop.permute.xlu0 %2052  ;;  %v3894_v28 = vsel %vm2113_vm13, 1.0, %v6562_v25  ;;  %v3829_v11 = vsel %vm1484_vm14, 1.0, %v6562_v25  ;;  %v3830_v45 = vsel %vm1485_vm15, 1.0, %v6562_v25  ;;  %vm2120_vm14 = vcmp.eq.s32.totalorder %v5717_v56, %v4973_v43 }
 0x201   :  { %4400 = vmatprep.mubr.msk.f32.mxu1 %vm641_vm1, %v3818_v33  ;;  %4460 = vmatprep.mubr.msk.f32.mxu0 %vm641_vm1, %v3882_v6  ;;  %v5815_v54 = vpop.permute.xlu1 %2708  ;;  %vm2115_vm3 = vcmp.eq.s32.totalorder %v2053_v50, %v4973_v43  ;;  %v6625_v6 = vld [vmem:[#allocation2_spill] sm:$0xff]  ;;  %v6626_v33 = vld [vmem:[#allocation12_spill] sm:$0xff]  ;;  %vm2121_vm15 = vcmp.eq.s32.totalorder %v5730_v9, %v4973_v43  ;;  %v3901_v56 = vsel %vm2120_vm14, 1.0, %v6562_v25 }
 0x202   :  { %vm1486_vm4 = vcmp.eq.s32.totalorder %v6625_v6, %v4973_v43  ;;  %vm1487_vm5 = vcmp.eq.s32.totalorder %v6626_v33, %v4973_v43  ;;  %v3896_v23 = vsel %vm2115_vm3, 1.0, %v6562_v25  ;;  %v3902_v9 = vsel %vm2121_vm15, 1.0, %v6562_v25  ;;  %v6636_v6 = vld [vmem:[#allocation23_spill] sm:$0xff] }
 0x203   :  { %v3832_v57 = vsel %vm1487_vm5, 1.0, %v6562_v25 }
 0x204   :  { %4401 = vmatmul.mubr.msk.f32.gmra.mxu1 %vm641_vm1, %v3819_v30  ;;  %4461 = vmatmul.mubr.msk.f32.gmra.mxu0 %vm641_vm1, %v3883_v61  ;;  %v3895_v61 = vsel %vm2114_vm2, 1.0, %v6562_v25 }
 0x205   :  { %4403 = vmatprep.mubr.msk.f32.mxu1 %vm641_vm1, %v3820_v26  ;;  %4463 = vmatprep.mubr.msk.f32.mxu0 %vm641_vm1, %v3884_v18  ;;  %v5838_v42 = vpop.permute.xlu1 %2082  ;;  %v3831_v18 = vsel %vm1486_vm4, 1.0, %v6562_v25  ;;  %v6627_v26 = vld [vmem:[#allocation16_spill] sm:$0xff]  ;;  %vm2122_vm4 = vcmp.eq.s32.totalorder %v5737_v49, %v4973_v43 }
 0x206   :  { %vm1488_vm8 = vcmp.eq.s32.totalorder %v6627_v26, %v4973_v43  ;;  %v3903_v49 = vsel %vm2122_vm4, 1.0, %v6562_v25 }
 0x208   :  { %4404 = vmatmul.mubr.msk.f32.gmra.mxu1 %vm641_vm1, %v3821_v34  ;;  %4464 = vmatmul.mubr.msk.f32.gmra.mxu0 %vm641_vm1, %v3885_v55  ;;  %v2065_v55 = vpop.permute.xlu0 %2064  ;;  %v3833_v34 = vsel %vm1488_vm8, 1.0, %v6562_v25  ;;  %vm2124_vm8 = vcmp.eq.s32.totalorder %v5788_v48, %v4973_v43 }
 0x209   :  { %4406 = vmatprep.mubr.msk.f32.mxu1 %vm641_vm1, %v3822_v32  ;;  %4466 = vmatprep.mubr.msk.f32.mxu0 %vm641_vm1, %v3886_v58  ;;  %v5866_v44 = vpop.permute.xlu1 %2085  ;;  %v3897_v58 = vsel %vm2116_vm6, 1.0, %v6562_v25  ;;  %vm2119_vm11 = vcmp.eq.s32.totalorder %v2065_v55, %v4973_v43  ;;  %v6629_v32 = vld [vmem:[#allocation17_spill] sm:$0xff]  ;;  %v3905_v48 = vsel %vm2124_vm8, 1.0, %v6562_v25 }
 0x20a   :  { %vm1490_vm12 = vcmp.eq.s32.totalorder %v6629_v32, %v4973_v43 }
 0x20b   :  { %v3835_v59 = vsel %vm1490_vm12, 1.0, %v6562_v25  ;;  %vm2126_vm12 = vcmp.eq.s32.totalorder %v5866_v44, %v4973_v43 }
 0x20c   :  { %4407 = vmatmul.mubr.msk.f32.gmra.mxu1 %vm641_vm1, %v3823_v0  ;;  %4467 = vmatmul.mubr.msk.f32.gmra.mxu0 %vm641_vm1, %v3887_v41  ;;  %v3834_v41 = vsel %vm1489_vm9, 1.0, %v6562_v25  ;;  %v3899_v0 = vsel %vm2118_vm10, 1.0, %v6562_v25  ;;  %vm2125_vm9 = vcmp.eq.s32.totalorder %v5838_v42, %v4973_v43  ;;  %vm1496_vm10 = vcmp.eq.s32.totalorder %v6635_v24, %v4973_v43 }
 0x20d   :  { %4409 = vmatprep.mubr.msk.f32.mxu1 %vm641_vm1, %v3824_v17  ;;  %4469 = vmatprep.mubr.msk.f32.mxu0 %vm641_vm1, %v3888_v51  ;;  %v5889_v30 = vpop.permute.xlu1 %2717  ;;  %v6630_v51 = vld [vmem:[#allocation19_spill] sm:$0xff]  ;;  %v3900_v17 = vsel %vm2119_vm11, 1.0, %v6562_v25  ;;  %vm1497_vm11 = vcmp.eq.s32.totalorder %v6636_v6, %v4973_v43  ;;  %v3841_v33 = vsel %vm1496_vm10, 1.0, %v6562_v25 }
 0x20e   :  { %vm1491_vm13 = vcmp.eq.s32.totalorder %v6630_v51, %v4973_v43  ;;  %v6643_v6 = vld [vmem:[#allocation27_spill] sm:$0xff] }
 0x210   :  { %4410 = vmatmul.mubr.msk.f32.gmra.mxu1 %vm641_vm1, %v3825_v40  ;;  %4470 = vmatmul.mubr.msk.f32.gmra.mxu0 %vm641_vm1, %v3889_v29  ;;  %v6631_v29 = vld [vmem:[#allocation7_spill] sm:$0xff]  ;;  %v2077_v40 = vpop.permute.xlu0 %2076 }
 0x211   :  { %4412 = vmatprep.mubr.msk.f32.mxu1 %vm641_vm1, %v3826_v31  ;;  %4472 = vmatprep.mubr.msk.f32.mxu0 %vm641_vm1, %v3890_v3  ;;  %v2092_v14 = vpop.permute.xlu1 %2091  ;;  %vm1492_vm2 = vcmp.eq.s32.totalorder %v6631_v29, %v4973_v43  ;;  %v3836_v3 = vsel %vm1491_vm13, 1.0, %v6562_v25  ;;  %v6632_v31 = vld [vmem:[#allocation20_spill] sm:$0xff]  ;;  %vm2123_vm5 = vcmp.eq.s32.totalorder %v2077_v40, %v4973_v43 }
 0x212   :  { %vm1493_vm3 = vcmp.eq.s32.totalorder %v6632_v31, %v4973_v43  ;;  %v3904_v50 = vsel %vm2123_vm5, 1.0, %v6562_v25  ;;  %vm2128_vm15 = vcmp.eq.s32.totalorder %v2092_v14, %v4973_v43  ;;  %v6004_v14 = vpop.f32.mrf.mxu1 }
 0x213   :  { %v3838_v16 = vsel %vm1493_vm3, 1.0, %v6562_v25  ;;  %v3909_v55 = vsel %vm2128_vm15, 1.0, %v6562_v25 }
 0x214   :  { %4413 = vmatmul.mubr.msk.f32.gmra.mxu1 %vm641_vm1, %v3827_v2  ;;  %4473 = vmatmul.mubr.msk.f32.gmra.mxu0 %vm641_vm1, %v3891_v15  ;;  %v3837_v15 = vsel %vm1492_vm2, 1.0, %v6562_v25  ;;  %v6633_v2 = vld [vmem:[#allocation8_spill] sm:$0xff] }
 0x215   :  { %4415 = vmatprep.mubr.msk.f32.mxu1 %vm641_vm1, %v3828_v47  ;;  %4475 = vmatprep.mubr.msk.f32.mxu0 %vm641_vm1, %v3892_v37  ;;  %v5937_v37 = vpop.permute.xlu1 %2720  ;;  %vm1494_vm6 = vcmp.eq.s32.totalorder %v6633_v2, %v4973_v43  ;;  %v6634_v47 = vld [vmem:[#allocation22_spill] sm:$0xff] }
 0x216   :  { %vm1495_vm7 = vcmp.eq.s32.totalorder %v6634_v47, %v4973_v43 }
 0x218   :  { %4416 = vmatmul.mubr.msk.f32.gmra.mxu1 %vm641_vm1, %v3829_v11  ;;  %4476 = vmatmul.mubr.msk.f32.gmra.mxu0 %vm641_vm1, %v3893_v13  ;;  %v3839_v13 = vsel %vm1494_vm6, 1.0, %v6562_v25  ;;  %v2089_v11 = vpop.permute.xlu0 %2088 }
 0x219   :  { %4418 = vmatprep.mubr.msk.f32.mxu1 %vm641_vm1, %v3830_v45  ;;  %4478 = vmatprep.mubr.msk.f32.mxu0 %vm641_vm1, %v3894_v28  ;;  %v3840_v28 = vsel %vm1495_vm7, 1.0, %v6562_v25  ;;  %v2095_v42 = vpop.permute.xlu1 %2094  ;;  %v3906_v45 = vsel %vm2125_vm9, 1.0, %v6562_v25  ;;  %vm2127_vm13 = vcmp.eq.s32.totalorder %v2089_v11, %v4973_v43 }
 0x21a   :  { %v3908_v44 = vsel %vm2127_vm13, 1.0, %v6562_v25  ;;  %vm2129_vm2 = vcmp.eq.s32.totalorder %v2095_v42, %v4973_v43  ;;  %v6644_v42 = vld [vmem:[#allocation28_spill] sm:$0xff] }
 0x21c   :  { %4419 = vmatmul.mubr.msk.f32.gmra.mxu1 %vm641_vm1, %v3831_v18  ;;  %4479 = vmatmul.mubr.msk.f32.gmra.mxu0 %vm641_vm1, %v3895_v61  ;;  %v6637_v61 = vld [vmem:[#allocation10_spill] sm:$0xff]  ;;  %v3907_v18 = vsel %vm2126_vm12, 1.0, %v6562_v25 }
 0x21d   :  { %4421 = vmatprep.mubr.msk.f32.mxu1 %vm641_vm1, %v3832_v57  ;;  %4481 = vmatprep.mubr.msk.f32.mxu0 %vm641_vm1, %v3896_v23  ;;  %vm1498_vm14 = vcmp.eq.s32.totalorder %v6637_v61, %v4973_v43  ;;  %v3842_v23 = vsel %vm1497_vm11, 1.0, %v6562_v25  ;;  %v2098_v57 = vpop.permute.xlu1 %2097 }
 0x21e   :  { %v3843_v26 = vsel %vm1498_vm14, 1.0, %v6562_v25  ;;  %vm2130_vm3 = vcmp.eq.s32.totalorder %v2098_v57, %v4973_v43 }
 0x21f   :  { %v3911_v32 = vsel %vm2130_vm3, 1.0, %v6562_v25 }
 0x220   :  { %4422 = vmatmul.mubr.msk.f32.gmra.mxu1 %vm641_vm1, %v3833_v34  ;;  %4482 = vmatmul.mubr.msk.f32.gmra.mxu0 %vm641_vm1, %v3897_v58  ;;  %v3910_v58 = vsel %vm2129_vm2, 1.0, %v6562_v25  ;;  %v6640_v34 = vld [vmem:[#allocation4_spill] sm:$0xff] }
 0x221   :  { %4424 = vmatprep.mubr.msk.f32.mxu1 %vm641_vm1, %v3834_v41  ;;  %4484 = vmatprep.mubr.msk.f32.mxu0 %vm641_vm1, %v3898_v35  ;;  %v6639_v35 = vld [vmem:[#allocation3_spill] sm:$0xff] }
 0x222   :  { %vm2731_vm4 = vcmp.eq.s32.totalorder %v6639_v35, %v4973_v43  ;;  %v6641_v41 = vld [vmem:[#allocation15_spill] sm:$0xff]  ;;  %v2640_v35 = vpop.permute.xlu0 %2639 }
 0x223   :  { %v3948_v51 = vsel %vm2731_vm4, 1.0, %v6562_v25  ;;  %vm2732_vm5 = vcmp.eq.s32.totalorder %v2640_v35, %v4973_v43  ;;  %v6664_v35 = vld [vmem:[#allocation21_spill] sm:$0xff] }
 0x224   :  { %4425 = vmatmul.mubr.msk.f32.gmra.mxu1 %vm641_vm1, %v3835_v59  ;;  %4485 = vmatmul.mubr.msk.f32.gmra.mxu0 %vm641_vm1, %v3899_v0  ;;  %v6642_v0 = vld [vmem:[#allocation6_spill] sm:$0xff]  ;;  %vm2735_vm8 = vcmp.eq.s32.totalorder %v6664_v35, %v4973_v43 }
 0x225   :  { %4427 = vmatprep.mubr.msk.f32.mxu1 %vm641_vm1, %v3836_v3  ;;  %4487 = vmatprep.mubr.msk.f32.mxu0 %vm641_vm1, %v3900_v17 }
 0x228   :  { %4428 = vmatmul.mubr.msk.f32.gmra.mxu1 %vm641_vm1, %v3837_v15  ;;  %4488 = vmatmul.mubr.msk.f32.gmra.mxu0 %vm641_vm1, %v3901_v56 }
 0x229   :  { %4430 = vmatprep.mubr.msk.f32.mxu1 %vm641_vm1, %v3838_v16  ;;  %4490 = vmatprep.mubr.msk.f32.mxu0 %vm641_vm1, %v3902_v9 }
 0x22c   :  { %4431 = vmatmul.mubr.msk.f32.gmra.mxu1 %vm641_vm1, %v3839_v13  ;;  %4491 = vmatmul.mubr.msk.f32.gmra.mxu0 %vm641_vm1, %v3903_v49 }
 0x22d   :  { %4433 = vmatprep.mubr.msk.f32.mxu1 %vm641_vm1, %v3840_v28  ;;  %4493 = vmatprep.mubr.msk.f32.mxu0 %vm641_vm1, %v3904_v50 }
 0x230   :  { %4434 = vmatmul.mubr.msk.f32.gmra.mxu1 %vm641_vm1, %v3841_v33  ;;  %4494 = vmatmul.mubr.msk.f32.gmra.mxu0 %vm641_vm1, %v3905_v48  ;;  %v6645_v33 = vld [vmem:[#allocation30_spill] sm:$0xff] }
 0x231   :  { %4436 = vmatprep.mubr.msk.f32.mxu1 %vm641_vm1, %v3842_v23  ;;  %4496 = vmatprep.mubr.msk.f32.mxu0 %vm641_vm1, %v3906_v45  ;;  %v6646_v23 = vld [vmem:[#allocation31_spill] sm:$0xff] }
 0x234   :  { %4437 = vmatmul.mubr.msk.f32.gmra.mxu1 %vm641_vm1, %v3843_v26  ;;  %4497 = vmatmul.mubr.msk.f32.gmra.mxu0 %vm641_vm1, %v3907_v18 }
 0x235   :  { %4499 = vmatprep.mubr.msk.f32.mxu0 %vm641_vm1, %v3908_v44  ;;  %4509 = vmatprep.mubr.msk.f32.mxu1 %vm72_vm0, %v6638_v7  ;;  %v6647_v44 = vld [vmem:[#allocation32_spill] sm:$0xff]  ;;  %v6648_v7 = vld [vmem:[#allocation33_spill] sm:$0xff] }
 0x238   :  { %4500 = vmatmul.mubr.msk.f32.gmra.mxu0 %vm641_vm1, %v3909_v55  ;;  %4510 = vmatmul.mubr.msk.f32.vlgmr.msra.gmra.mxu1 %vm72_vm0, %v6640_v34 }
 0x239   :  { %4502 = vmatprep.mubr.msk.f32.mxu0 %vm641_vm1, %v3910_v58  ;;  %4512 = vmatprep.mubr.msk.f32.mxu1 %vm72_vm0, %v6641_v41 }
 0x23c   :  { %4503 = vmatmul.mubr.msk.f32.gmra.mxu0 %vm641_vm1, %v3911_v32  ;;  %4513 = vmatmul.mubr.msk.f32.gmra.mxu1 %vm72_vm0, %v6642_v0  ;;  %v6649_v32 = vld [vmem:[#allocation34_spill] sm:$0xff] }
 0x23d   :  { %4523 = vmatprep.mubr.msk.f32.mxu1 %vm641_vm1, %v3948_v51 }
 0x2b8   :  { %v4393_v17 = vpop.f32.mrf.mxu1 }
 0x2b9   :  { %v6007_v59 = vadd.f32 %v4393_v17, %v5687_v38 }
 0x2ba   :  { %v1725_v29 = vpop.f32.mrf.mxu1 }
 0x2bb   :  { %v6010_v3 = vadd.f32 %v1725_v29, %v5690_v12  ;;  %v6650_v29 = vld [vmem:[#allocation35_spill] sm:$0xff] }
 0x2bc   :  { %v4396_v40 = vpop.f32.mrf.mxu1 }
 0x2bd   :  { %v6013_v31 = vadd.f32 %v4396_v40, %v5693_v22 }
 0x2be   :  { %v1735_v56 = vpop.f32.mrf.mxu1 }
 0x2bf   :  { %v6016_v9 = vadd.f32 %v1735_v56, %v5698_v46  ;;  %v2643_v56 = vpop.permute.xlu0 %2642 }
 0x2c0   :  { %v4399_v15 = vpop.f32.mrf.mxu1  ;;  %vm2733_vm6 = vcmp.eq.s32.totalorder %v2643_v56, %v4973_v43  ;;  %v3952_v56 = vsel %vm2735_vm8, 1.0, %v6562_v25 }
 0x2c1   :  { %v6019_v2 = vadd.f32 %v4399_v15, %v5701_v39  ;;  %v6651_v15 = vld [vmem:[#allocation36_spill] sm:$0xff] }
 0x2c2   :  { %v1745_v16 = vpop.f32.mrf.mxu1 }
 0x2c3   :  { %v6022_v38 = vadd.f32 %v1745_v16, %v5704_v63 }
 0x2c4   :  { %v4402_v47 = vpop.f32.mrf.mxu1 }
 0x2c5   :  { %v6025_v12 = vadd.f32 %v4402_v47, %v5709_v62 }
 0x2c6   :  { %v1755_v49 = vpop.f32.mrf.mxu1 }
 0x2c7   :  { %v6028_v22 = vadd.f32 %v1755_v49, %v5712_v19 }
 0x2c8   :  { %v4405_v50 = vpop.f32.mrf.mxu1 }
 0x2c9   :  { %v6031_v46 = vadd.f32 %v4405_v50, %v5715_v20 }
 0x2ca   :  { %v1765_v13 = vpop.f32.mrf.mxu1 }
 0x2cb   :  { %v6034_v39 = vadd.f32 %v1765_v13, %v5720_v1 }
 0x2cc   :  { %v4408_v24 = vpop.f32.mrf.mxu1 }
 0x2cd   :  { %v6037_v63 = vadd.f32 %v4408_v24, %v5723_v8  ;;  %v2652_v24 = vpop.permute.xlu0 %2651 }
 0x2ce   :  { %v1775_v28 = vpop.f32.mrf.mxu1  ;;  %vm2736_vm9 = vcmp.eq.s32.totalorder %v2652_v24, %v4973_v43 }
 0x2cf   :  { %v6040_v62 = vadd.f32 %v1775_v28, %v5726_v53  ;;  %v6652_v28 = vld [vmem:[#allocation38_spill] sm:$0xff] }
 0x2d0   :  { %v4411_v11 = vpop.f32.mrf.mxu1 }
 0x2d1   :  { %v6043_v19 = vadd.f32 %v4411_v11, %v6643_v6 }
 0x2d2   :  { %v1785_v48 = vpop.f32.mrf.mxu1 }
 0x2d3   :  { %v6046_v20 = vadd.f32 %v1785_v48, %v6644_v42 }
 0x2d4   :  { %v4414_v45 = vpop.f32.mrf.mxu1 }
 0x2d5   :  { %v6049_v1 = vadd.f32 %v4414_v45, %v6645_v33  ;;  %v2655_v33 = vpop.permute.xlu0 %2654 }
 0x2d6   :  { %v1795_v61 = vpop.f32.mrf.mxu1  ;;  %vm2737_vm10 = vcmp.eq.s32.totalorder %v2655_v33, %v4973_v43 }
 0x2d7   :  { %v6052_v8 = vadd.f32 %v1795_v61, %v6646_v23  ;;  %v6655_v61 = vld [vmem:[#allocation39_spill] sm:$0xff] }
 0x2d8   :  { %v4417_v18 = vpop.f32.mrf.mxu1 }
 0x2d9   :  { %v6055_v53 = vadd.f32 %v4417_v18, %v6647_v44  ;;  %v6657_v18 = vld [vmem:[#allocation41_spill] sm:$0xff] }
 0x2da   :  { %v1805_v26 = vpop.f32.mrf.mxu1 }
 0x2db   :  { %v6058_v57 = vadd.f32 %v1805_v26, %v5646_v10 }
 0x2dc   :  { %v4420_v55 = vpop.f32.mrf.mxu1 }
 0x2dd   :  { %v6061_v58 = vadd.f32 %v4420_v55, %v6648_v7  ;;  %v6659_v55 = vld [vmem:[#allocation43_spill] sm:$0xff] }
 0x2de   :  { %v1815_v34 = vpop.f32.mrf.mxu1  ;;  %v1276_v7 = vadd.f32 %v6004_v14, %v6659_v55  ;;  %v3949_v14 = vsel %vm2732_vm5, 1.0, %v6562_v25 }
 0x2df   :  { %v6064_v41 = vadd.f32 %v1815_v34, %v6649_v32  ;;  %v6660_v34 = vld [vmem:[#allocation42_spill] sm:$0xff]  ;;  %v2664_v32 = vpop.permute.xlu0 %2663 }
 0x2e0   :  { %v4423_v51 = vpop.f32.mrf.mxu1  ;;  %vm2740_vm13 = vcmp.eq.s32.totalorder %v2664_v32, %v4973_v43 }
 0x2e1   :  { %v6067_v0 = vadd.f32 %v4423_v51, %v5654_v60 }
 0x2e2   :  { %v1825_v17 = vpop.f32.mrf.mxu1 }
 0x2e3   :  { %v6070_v40 = vadd.f32 %v1825_v17, %v6650_v29 }
 0x2e4   :  { %v4426_v10 = vpop.f32.mrf.mxu1 }
 0x2e5   :  { %v6073_v16 = vadd.f32 %v4426_v10, %v6651_v15  ;;  %v2667_v10 = vpop.permute.xlu0 %2666 }
 0x2e6   :  { %v1835_v47 = vpop.f32.mrf.mxu1  ;;  %vm2741_vm14 = vcmp.eq.s32.totalorder %v2667_v10, %v4973_v43 }
 0x2e7   :  { %v6076_v49 = vadd.f32 %v1835_v47, %v5662_v4 }
 0x2e8   :  { %v4429_v50 = vpop.f32.mrf.mxu1 }
 0x2e9   :  { %v6079_v13 = vadd.f32 %v4429_v50, %v5664_v52  ;;  %v2676_v50 = vpop.permute.xlu0 %2675 }
 0x2ea   :  { %v1845_v60 = vpop.f32.mrf.mxu1  ;;  %vm2744_vm3 = vcmp.eq.s32.totalorder %v2676_v50, %v4973_v43 }
 0x2eb   :  { %v6082_v11 = vadd.f32 %v1845_v60, %v6652_v28  ;;  %v6663_v60 = vld [vmem:[#allocation18_spill] sm:$0xff]  ;;  %v3950_v28 = vsel %vm2733_vm6, 1.0, %v6562_v25 }
 0x2ec   :  { %v4432_v6 = vpop.f32.mrf.mxu1  ;;  %vm2734_vm7 = vcmp.eq.s32.totalorder %v6663_v60, %v4973_v43  ;;  %v6670_v60 = vld [vmem:[#allocation40_spill] sm:$0xff] }
 0x2ed   :  { %v6085_v48 = vadd.f32 %v4432_v6, %v5670_v36  ;;  %v2679_v6 = vpop.permute.xlu0 %2678  ;;  %vm2747_vm6 = vcmp.eq.s32.totalorder %v6670_v60, %v4973_v43 }
 0x2ee   :  { %v1855_v42 = vpop.f32.mrf.mxu1  ;;  %vm2745_vm4 = vcmp.eq.s32.totalorder %v2679_v6, %v4973_v43  ;;  %v3964_v35 = vsel %vm2747_vm6, 1.0, %v6562_v25 }
 0x2ef   :  { %6653 = vst [vmem:[#allocation13_spill] sm:$0xff] %v6085_v48  ;;  %v6088_v45 = vadd.f32 %v1855_v42, %v5672_v21  ;;  %v3951_v42 = vsel %vm2734_vm7, 1.0, %v6562_v25 }
 0x2f0   :  { %v4435_v4 = vpop.f32.mrf.mxu1 }
 0x2f1   :  { %6654 = vst [vmem:[#allocation11_spill] sm:$0xff] %v6088_v45  ;;  %v6091_v23 = vadd.f32 %v4435_v4, %v6655_v61  ;;  %v3953_v4 = vsel %vm2736_vm9, 1.0, %v6562_v25  ;;  %v6665_v61 = vld [vmem:[#allocation24_spill] sm:$0xff] }
 0x2f2   :  { %v1865_v52 = vpop.f32.mrf.mxu1  ;;  %vm2738_vm11 = vcmp.eq.s32.totalorder %v6665_v61, %v4973_v43 }
 0x2f3   :  { %6656 = vst [vmem:[#allocation2_spill] sm:$0xff] %v6091_v23  ;;  %v6094_v44 = vadd.f32 %v1865_v52, %v6657_v18  ;;  %v3954_v52 = vsel %vm2737_vm10, 1.0, %v6562_v25  ;;  %v2688_v18 = vpop.permute.xlu0 %2687  ;;  %v3955_v24 = vsel %vm2738_vm11, 1.0, %v6562_v25  ;;  %vm2751_vm10 = vcmp.eq.s32.totalorder %v5728_v5, %v4973_v43 }
 0x2f4   :  { %v4438_v26 = vpop.f32.mrf.mxu1  ;;  %vm2748_vm7 = vcmp.eq.s32.totalorder %v2688_v18, %v4973_v43 }
 0x2f5   :  { %6658 = vst [vmem:[#allocation12_spill] sm:$0xff] %v6094_v44  ;;  %v6099_v36 = vadd.f32 %v4438_v26, %v6660_v34  ;;  %v6666_v26 = vld [vmem:[#allocation25_spill] sm:$0xff]  ;;  %v6667_v34 = vld [vmem:[#allocation26_spill] sm:$0xff]  ;;  %v3965_v6 = vsel %vm2748_vm7, 1.0, %v6562_v25 }
 0x2f6   :  { %v1875_v51 = vpop.f32.mrf.mxu1  ;;  %vm2739_vm12 = vcmp.eq.s32.totalorder %v6666_v26, %v4973_v43  ;;  %vm2742_vm15 = vcmp.eq.s32.totalorder %v6667_v34, %v4973_v43 }
 0x2f7   :  { %6661 = vst [vmem:[#allocation16_spill] sm:$0xff] %v6099_v36  ;;  %v6101_v21 = vadd.f32 %v1875_v51, %v1276_v7  ;;  %v3956_v33 = vsel %vm2739_vm12, 1.0, %v6562_v25  ;;  %v2691_v55 = vpop.permute.xlu0 %2690  ;;  %v3957_v7 = vsel %vm2740_vm13, 1.0, %v6562_v25  ;;  %v3958_v51 = vsel %vm2741_vm14, 1.0, %v6562_v25  ;;  %v6233_v36 = vld [vmem:[%s6514_s3] ss:$0 sm:$0xff] }
 0x2f8   :  { %v4511_v17 = vpop.f32.mrf.mxu1  ;;  %v3959_v32 = vsel %vm2742_vm15, 1.0, %v6562_v25  ;;  %vm2749_vm8 = vcmp.eq.s32.totalorder %v2691_v55, %v4973_v43  ;;  %vm2754_vm13 = vcmp.eq.s32.totalorder %v5765_v27, %v4973_v43  ;;  %vm2755_vm14 = vcmp.eq.s32.totalorder %v5815_v54, %v4973_v43 }
 0x2f9   :  { %6662 = vst [vmem:[#allocation5_spill] sm:$0xff] %v6101_v21 }
 0x2fa   :  { %v2616_v29 = vpop.f32.mrf.mxu1 }
 0x2fb   :  { %v2700_v10 = vpop.permute.xlu0 %2699 }
 0x2fc   :  { %v4514_v15 = vpop.f32.mrf.mxu1  ;;  %vm2752_vm11 = vcmp.eq.s32.totalorder %v2700_v10, %v4973_v43 }
 0x2fd   :  { %4515 = vmatprep.subr.mxu1 %v4514_v15  ;;  %v3969_v26 = vsel %vm2752_vm11, 1.0, %v6562_v25  ;;  %vm3465_vm11 = vcmask 1044484  }
 0x2fe   :  { %v2626_v47 = vpop.f32.mrf.mxu1  ;;  %4516 = vmatpush3.msra.mxu1 %v4514_v15  ;;  %v3961_v15 = vsel %vm2744_vm3, 1.0, %v6562_v25  ;;  %vm2758_vm3 = vcmp.eq.s32.totalorder %v5889_v30, %v4973_v43 }
 0x2ff   :  { %4517 = vmatprep.subr.mxu1 %v2626_v47  ;;  %v2703_v50 = vpop.permute.xlu0 %2702  ;;  %v3975_v34 = vsel %vm2758_vm3, 1.0, %v6562_v25 }
 0x300   :  { %4518 = vmatpush3.msra.mxu1 %v2626_v47  ;;  %v6669_v47 = vld [vmem:[#allocation37_spill] sm:$0xff]  ;;  %vm2753_vm12 = vcmp.eq.s32.totalorder %v2703_v50, %v4973_v43 }
 0x301   :  { %4519 = vmatprep.subr.mxu1 %v4511_v17  ;;  %vm2746_vm5 = vcmp.eq.s32.totalorder %v6669_v47, %v4973_v43  ;;  %v3970_v5 = vsel %vm2753_vm12, 1.0, %v6562_v25  ;;  %vm3467_vm12 = vcmask 1045509  }
 0x302   :  { %4520 = vmatpush3.msra.mxu1 %v4511_v17  ;;  %v6668_v17 = vld [vmem:[#allocation29_spill] sm:$0xff] }
 0x303   :  { %4521 = vmatprep.subr.mxu1 %v2616_v29  ;;  %vm2743_vm2 = vcmp.eq.s32.totalorder %v6668_v17, %v4973_v43 }
 0x304   :  { %4522 = vmatpush3.msra.mxu1 %v2616_v29  ;;  %v3960_v29 = vsel %vm2743_vm2, 1.0, %v6562_v25 }
 0x305   :  { %4524 = vmatmul.mubr.msk.f32.vlgmr.msra.gmra.mxu1 %vm641_vm1, %v3949_v14  ;;  %v3962_v14 = vsel %vm2745_vm4, 1.0, %v6562_v25  ;;  %vm2759_vm4 = vcmp.eq.s32.totalorder %v5937_v37, %v4973_v43 }
 0x306   :  { %4526 = vmatprep.mubr.msk.f32.mxu1 %vm641_vm1, %v3950_v28  ;;  %v3963_v28 = vsel %vm2746_vm5, 1.0, %v6562_v25  ;;  %v3976_v17 = vsel %vm2759_vm4, 1.0, %v6562_v25 }
 0x309   :  { %4527 = vmatmul.mubr.msk.f32.gmra.mxu1 %vm641_vm1, %v3951_v42  ;;  %v6671_v42 = vld [vmem:[#allocation44_spill] sm:$0xff] }
 0x30a   :  { %4529 = vmatprep.mubr.msk.f32.mxu1 %vm641_vm1, %v3952_v56  ;;  %vm2750_vm9 = vcmp.eq.s32.totalorder %v6671_v42, %v4973_v43  ;;  %v3966_v56 = vsel %vm2749_vm8, 1.0, %v6562_v25  ;;  %vm3459_vm8 = vcmask 1041409  }
 0x30b   :  { %v3967_v61 = vsel %vm2750_vm9, 1.0, %v6562_v25  ;;  %vm3461_vm9 = vcmask 1042434  }
 0x30d   :  { %4530 = vmatmul.mubr.msk.f32.gmra.mxu1 %vm641_vm1, %v3953_v4  ;;  %v2712_v4 = vpop.permute.xlu0 %2711 }
 0x30e   :  { %4532 = vmatprep.mubr.msk.f32.mxu1 %vm641_vm1, %v3954_v52  ;;  %v3968_v52 = vsel %vm2751_vm10, 1.0, %v6562_v25  ;;  %vm2756_vm15 = vcmp.eq.s32.totalorder %v2712_v4, %v4973_v43  ;;  %vm3463_vm10 = vcmask 1043459  }
 0x30f   :  { %v3973_v27 = vsel %vm2756_vm15, 1.0, %v6562_v25  ;;  %vm3665_vm15 = vcmask 64512  }
 0x311   :  { %4533 = vmatmul.mubr.msk.f32.gmra.mxu1 %vm641_vm1, %v3955_v24  ;;  %v2715_v18 = vpop.permute.xlu0 %2714  ;;  %v3971_v24 = vsel %vm2754_vm13, 1.0, %v6562_v25  ;;  %vm3469_vm13 = vcmask 1046534  }
 0x312   :  { %4535 = vmatprep.mubr.msk.f32.mxu1 %vm641_vm1, %v3956_v33  ;;  %v3972_v33 = vsel %vm2755_vm14, 1.0, %v6562_v25  ;;  %vm2757_vm2 = vcmp.eq.s32.totalorder %v2715_v18, %v4973_v43  ;;  %vm3471_vm14 = vcmask 1047559  }
 0x313   :  { %v3974_v54 = vsel %vm2757_vm2, 1.0, %v6562_v25 }
 0x315   :  { %4536 = vmatmul.mubr.msk.f32.gmra.mxu1 %vm641_vm1, %v3957_v7  ;;  %v2724_v55 = vpop.permute.xlu0 %2723 }
 0x316   :  { %4538 = vmatprep.mubr.msk.f32.mxu1 %vm641_vm1, %v3958_v51  ;;  %v2730_v51 = vpop.permute.xlu1 %2729  ;;  %vm2760_vm5 = vcmp.eq.s32.totalorder %v2724_v55, %v4973_v43  ;;  %v3432_v55 = vld [vmem:[%s6513_s5 + $0x10] sm:$0xff] }
 0x317   :  { %vm2762_vm7 = vcmp.eq.s32.totalorder %v2730_v51, %v4973_v43  ;;  %v3977_v30 = vsel %vm2760_vm5, 1.0, %v6562_v25 }
 0x319   :  { %4539 = vmatmul.mubr.msk.f32.gmra.mxu1 %vm641_vm1, %v3959_v32  ;;  %v2727_v7 = vpop.permute.xlu0 %2726  ;;  %v3979_v32 = vsel %vm2762_vm7, 1.0, %v6562_v25 }
 0x31a   :  { %4541 = vmatprep.mubr.msk.f32.mxu1 %vm641_vm1, %v3960_v29  ;;  %vm2761_vm6 = vcmp.eq.s32.totalorder %v2727_v7, %v4973_v43  ;;  %v4459_v29 = vpop.f32.mrf.mxu0  ;;  %v3430_v7 = vld [vmem:[%s6513_s5] sm:$0xff] }
 0x31b   :  { %v3978_v37 = vsel %vm2761_vm6, 1.0, %v6562_v25  ;;  %v3435_v25 = vld [vmem:[%s6513_s5 + $0x28] sm:$0xff] }
 0x31c   :  { %v2357_v10 = vpop.f32.mrf.mxu0  ;;  %4571 = vmatprep.subr.mxu0 %v3435_v25 }
 0x31d   :  { %4542 = vmatmul.mubr.msk.f32.gmra.mxu1 %vm641_vm1, %v3961_v15  ;;  %4572 = vmatpush3.msra.mxu0 %v3435_v25 }
 0x31e   :  { %4544 = vmatprep.mubr.msk.f32.mxu1 %vm641_vm1, %v3962_v14  ;;  %v4462_v15 = vpop.f32.mrf.mxu0 }
 0x320   :  { %v2367_v47 = vpop.f32.mrf.mxu0 }
 0x321   :  { %4545 = vmatmul.mubr.msk.f32.gmra.mxu1 %vm641_vm1, %v3963_v28 }
 0x322   :  { %4547 = vmatprep.mubr.msk.f32.mxu1 %vm641_vm1, %v3964_v35  ;;  %v4465_v14 = vpop.f32.mrf.mxu0 }
 0x323   :  { %v2521_v44 = vadd.f32 %v4465_v14, %v6019_v2  ;;  %v6286_v14 = vld [vmem:[%s6515_s4] sm:$0xff] }
 0x324   :  { %v2377_v60 = vpop.f32.mrf.mxu0 }
 0x325   :  { %4548 = vmatmul.mubr.msk.f32.gmra.mxu1 %vm641_vm1, %v3965_v6  ;;  %v2520_v45 = vadd.f32 %v2377_v60, %v6022_v38 }
 0x326   :  { %4550 = vmatprep.mubr.msk.f32.mxu1 %vm641_vm1, %v3966_v56  ;;  %v4468_v50 = vpop.f32.mrf.mxu0 }
 0x328   :  { %v2387_v43 = vpop.f32.mrf.mxu0 }
 0x329   :  { %4551 = vmatmul.mubr.msk.f32.gmra.mxu1 %vm641_vm1, %v3967_v61 }
 0x32a   :  { %4553 = vmatprep.mubr.msk.f32.mxu1 %vm641_vm1, %v3968_v52  ;;  %v4471_v28 = vpop.f32.mrf.mxu0 }
 0x32c   :  { %v2397_v35 = vpop.f32.mrf.mxu0 }
 0x32d   :  { %4554 = vmatmul.mubr.msk.f32.gmra.mxu1 %vm641_vm1, %v3969_v26  ;;  %v6247_v48 = vadd.f32 %v2397_v35, %v6034_v39  ;;  %v6268_v39 = vld [vmem:[%s6515_s4 + $0x8] sm:$0xff] }
 0x32e   :  { %4556 = vmatprep.mubr.msk.f32.mxu1 %vm641_vm1, %v3970_v5  ;;  %v4474_v6 = vpop.f32.mrf.mxu0  ;;  %v3434_v5 = vld [vmem:[%s6513_s5 + $0x20] sm:$0xff] }
 0x32f   :  { %4573 = vmatprep.subr.mxu0 %v3434_v5 }
 0x330   :  { %v2407_v42 = vpop.f32.mrf.mxu0  ;;  %4574 = vmatpush3.msra.mxu0 %v3434_v5  ;;  %v2517_v5 = vadd.f32 %v4459_v29, %v6007_v59  ;;  %v2523_v59 = vadd.f32 %v4468_v50, %v6025_v12  ;;  %v6241_v29 = vadd.f32 %v2387_v43, %v6028_v22 }
 0x331   :  { %4557 = vmatmul.mubr.msk.f32.gmra.mxu1 %vm641_vm1, %v3971_v24  ;;  %v3433_v24 = vld [vmem:[%s6513_s5 + $0x18] sm:$0xff]  ;;  %v6254_v38 = vadd.f32 %v2407_v42, %v6040_v62 }
 0x332   :  { %4559 = vmatprep.mubr.msk.f32.mxu1 %vm641_vm1, %v3972_v33  ;;  %v4477_v56 = vpop.f32.mrf.mxu0  ;;  %4575 = vmatprep.subr.mxu0 %v3433_v24 }
 0x333   :  { %4576 = vmatpush3.msra.mxu0 %v3433_v24  ;;  %v6257_v12 = vadd.f32 %v4477_v56, %v6043_v19 }
 0x334   :  { %v2417_v4 = vpop.f32.mrf.mxu0  ;;  %4577 = vmatprep.subr.mxu0 %v3432_v55 }
 0x335   :  { %4560 = vmatmul.mubr.msk.f32.gmra.mxu1 %vm641_vm1, %v3973_v27  ;;  %v3431_v27 = vld [vmem:[%s6513_s5 + $0x8] sm:$0xff]  ;;  %4578 = vmatpush3.msra.mxu0 %v3432_v55  ;;  %v2516_v55 = vadd.f32 %v2357_v10, %v6010_v3  ;;  %v6244_v3 = vadd.f32 %v4471_v28, %v6031_v46  ;;  %v6260_v22 = vadd.f32 %v2417_v4, %v6046_v20 }
 0x336   :  { %4562 = vmatprep.mubr.msk.f32.mxu1 %vm641_vm1, %v3974_v54  ;;  %v4480_v61 = vpop.f32.mrf.mxu0  ;;  %4579 = vmatprep.subr.mxu0 %v3431_v27 }
 0x337   :  { %4580 = vmatpush3.msra.mxu0 %v3431_v27  ;;  %v2519_v27 = vadd.f32 %v4462_v15, %v6013_v31  ;;  %v6250_v31 = vadd.f32 %v4474_v6, %v6037_v63  ;;  %v6263_v46 = vadd.f32 %v4480_v61, %v6049_v1 }
 0x338   :  { %v2427_v52 = vpop.f32.mrf.mxu0  ;;  %4581 = vmatprep.subr.mxu0 %v3430_v7 }
 0x339   :  { %4563 = vmatmul.mubr.msk.f32.gmra.mxu1 %vm641_vm1, %v3975_v34  ;;  %4582 = vmatpush3.msra.mxu0 %v3430_v7  ;;  %v2518_v7 = vadd.f32 %v2367_v47, %v6016_v9 }
 0x33a   :  { %4565 = vmatprep.mubr.msk.f32.mxu1 %vm641_vm1, %v3976_v17  ;;  %v4483_v18 = vpop.f32.mrf.mxu0 }
 0x33b   :  { %v6275_v47 = vadd.f32 %v4483_v18, %v6055_v53 }
 0x33c   :  { %v2437_v26 = vpop.f32.mrf.mxu0 }
 0x33d   :  { %4566 = vmatmul.mubr.msk.f32.gmra.mxu1 %vm641_vm1, %v3977_v30  ;;  %v6278_v20 = vadd.f32 %v2437_v26, %v6058_v57 }
 0x33e   :  { %4568 = vmatprep.mubr.msk.f32.mxu1 %vm641_vm1, %v3978_v37  ;;  %v4486_v33 = vpop.f32.mrf.mxu0 }
 0x33f   :  { %v6281_v1 = vadd.f32 %v4486_v33, %v6061_v58 }
 0x340   :  { %v2447_v54 = vpop.f32.mrf.mxu0 }
 0x341   :  { %4569 = vmatmul.mubr.msk.f32.gmra.mxu1 %vm641_vm1, %v3979_v32  ;;  %vm3285_vm1 = vcmask 392192   ;;  %v6291_v57 = vadd.f32 %v2447_v54, %v6064_v41 }
 0x342   :  { %v4489_v34 = vpop.f32.mrf.mxu0 }
 0x343   :  { %v6294_v58 = vadd.f32 %v4489_v34, %v6067_v0 }
 0x344   :  { %v2457_v51 = vpop.f32.mrf.mxu0 }
 0x345   :  { %v6297_v35 = vadd.f32 %v2457_v51, %v6070_v40  ;;  %v6672_v51 = vld [vmem:[#allocation13_spill] sm:$0xff] }
 0x346   :  { %v4492_v17 = vpop.f32.mrf.mxu0 }
 0x347   :  { %v6300_v6 = vadd.f32 %v4492_v17, %v6073_v16 }
 0x348   :  { %v2467_v30 = vpop.f32.mrf.mxu0 }
 0x349   :  { %v6303_v56 = vadd.f32 %v2467_v30, %v6076_v49  ;;  %v6673_v30 = vld [vmem:[#allocation11_spill] sm:$0xff] }
 0x34a   :  { %v4495_v37 = vpop.f32.mrf.mxu0 }
 0x34b   :  { %v6308_v41 = vadd.f32 %v4495_v37, %v6079_v13 }
 0x34c   :  { %v2477_v32 = vpop.f32.mrf.mxu0 }
 0x34d   :  { %v6311_v0 = vadd.f32 %v2477_v32, %v6082_v11 }
 0x34e   :  { %v4498_v25 = vpop.f32.mrf.mxu0 }
 0x34f   :  { %v6317_v17 = vadd.f32 %v4498_v25, %v6672_v51 }
 0x350   :  { %v2487_v24 = vpop.f32.mrf.mxu0 }
 0x351   :  { %v6320_v13 = vadd.f32 %v2487_v24, %v6673_v30 }
 0x352   :  { %v4501_v9 = vpop.f32.mrf.mxu0 }
 0x354   :  { %v2497_v60 = vpop.f32.mrf.mxu0 }
 0x356   :  { %v4504_v26 = vpop.f32.mrf.mxu0 }
 0x3c5   :  { %v4525_v21 = vpop.f32.mrf.mxu1 }
 0x3c6   :  { %v3149_v23 = vadd.f32 %v4525_v21, %v2517_v5  ;;  %v6674_v5 = vld [vmem:[#allocation2_spill] sm:$0xff] }
 0x3c7   :  { %v2989_v10 = vpop.f32.mrf.mxu1 }
 0x3c8   :  { %v3188_v2 = vadd.f32 %v6233_v36, %v3149_v23  ;;  %v3148_v21 = vadd.f32 %v2989_v10, %v2516_v55  ;;  %v6271_v23 = vadd.f32 %v2427_v52, %v6052_v8  ;;  %v6675_v10 = vld [vmem:[#allocation12_spill] sm:$0xff] }
 0x3c9   :  { %v4528_v63 = vpop.f32.mrf.mxu1 }
 0x3ca   :  { %v3220_v62 = vmax.f32 %v3188_v2, 0.0  ;;  %v3187_v15 = vadd.f32 %v6233_v36, %v3148_v21  ;;  %v3151_v19 = vadd.f32 %v4528_v63, %v2519_v27  ;;  %v2507_v63 = vpop.f32.mrf.mxu0 }
 0x3cb   :  { %v2999_v8 = vpop.f32.mrf.mxu1 }
 0x3cc   :  { %v3254_v50 = vmul.f32 %v6268_v39, %v3220_v62  ;;  %v3219_v43 = vmax.f32 %v3187_v15, 0.0  ;;  %v3190_v53 = vadd.f32 %v6233_v36, %v3151_v19  ;;  %v3150_v28 = vadd.f32 %v2999_v8, %v2518_v7  ;;  %v6676_v8 = vld [vmem:[#allocation16_spill] sm:$0xff] }
 0x3cd   :  { %v4531_v42 = vpop.f32.mrf.mxu1 }
 0x3ce   :  { %v3253_v4 = vmul.f32 %v6286_v14, %v3219_v43  ;;  %v3222_v61 = vmax.f32 %v3190_v53, 0.0  ;;  %v3189_v52 = vadd.f32 %v6233_v36, %v3150_v28  ;;  %v3287_v40 = vsel %vm3285_vm1, %v3254_v50, -inf }
 0x3cf   :  { %v3153_v18 = vadd.f32 %v4531_v42, %v2521_v44  ;;  %v3009_v16 = vpop.f32.mrf.mxu1  ;;  %v6324_v44 = vadd.f32 %v4501_v9, %v6674_v5  ;;  %v6336_v50 = vadd.f32 %v4504_v26, %v6676_v8 }
 0x3d0   :  { %v3286_v33 = vsel %vm3285_vm1, %v3253_v4, -inf  ;;  %v3256_v49 = vmul.f32 %v6268_v39, %v3222_v61  ;;  %v3221_v54 = vmax.f32 %v3189_v52, 0.0  ;;  %v3152_v34 = vadd.f32 %v3009_v16, %v2520_v45  ;;  %v6677_v52 = vld [vmem:[#allocation5_spill] sm:$0xff] }
 0x3d1   :  { %v3288_v37 = vmax.f32 %v3286_v33, %v3287_v40  ;;  %v3192_v11 = vadd.f32 %v6233_v36, %v3153_v18  ;;  %v4534_v32 = vpop.f32.mrf.mxu1  ;;  %v6329_v45 = vadd.f32 %v2497_v60, %v6675_v10  ;;  %v6343_v40 = vadd.f32 %v2507_v63, %v6677_v52 }
 0x3d2   :  { %v3255_v55 = vmul.f32 %v6286_v14, %v3221_v54  ;;  %v3191_v27 = vadd.f32 %v6233_v36, %v3152_v34  ;;  %v3155_v7 = vadd.f32 %v4534_v32, %v2523_v59  ;;  %v3296_v2 = vsel %vm3285_vm1, %v3256_v49, -inf }
 0x3d3   :  { %v3289_v25 = vrot.slane %v3288_v37, 4  ;;  %v3224_v24 = vmax.f32 %v3192_v11, 0.0  ;;  %v3019_v21 = vpop.f32.mrf.mxu1 }
 0x3d4   :  { %v3295_v62 = vsel %vm3285_vm1, %v3255_v55, -inf  ;;  %v3223_v15 = vmax.f32 %v3191_v27, 0.0  ;;  %v3194_v9 = vadd.f32 %v6233_v36, %v3155_v7  ;;  %v3154_v19 = vadd.f32 %v3019_v21, %v6241_v29 }
 0x3d5   :  { %v3290_v59 = vmax.f32 %v3288_v37, %v3289_v25  ;;  %v3297_v43 = vmax.f32 %v3295_v62, %v3296_v2  ;;  %v3258_v60 = vmul.f32 %v6268_v39, %v3224_v24  ;;  %v4537_v53 = vpop.f32.mrf.mxu1 }
 0x3d6   :  { %v3257_v28 = vmul.f32 %v6286_v14, %v3223_v15  ;;  %v3226_v42 = vmax.f32 %v3194_v9, 0.0  ;;  %v3193_v4 = vadd.f32 %v6233_v36, %v3154_v19  ;;  %v3157_v61 = vadd.f32 %v4537_v53, %v6244_v3 }
 0x3d7   :  { %v3291_v18 = vrot.slane %v3290_v59, 2  ;;  %v3298_v29 = vrot.slane %v3297_v43, 4  ;;  %v3305_v16 = vsel %vm3285_vm1, %v3258_v60, -inf  ;;  %v3029_v26 = vpop.f32.mrf.mxu1 }
 0x3d8   :  { %v3304_v33 = vsel %vm3285_vm1, %v3257_v28, -inf  ;;  %v3260_v49 = vmul.f32 %v6268_v39, %v3226_v42  ;;  %v3225_v54 = vmax.f32 %v3193_v4, 0.0  ;;  %v3196_v34 = vadd.f32 %v6233_v36, %v3157_v61 }
 0x3d9   :  { %v3292_v51 = vmax.f32 %v3290_v59, %v3291_v18  ;;  %v3299_v30 = vmax.f32 %v3297_v43, %v3298_v29  ;;  %v3306_v37 = vmax.f32 %v3304_v33, %v3305_v16  ;;  %v3156_v3 = vadd.f32 %v3029_v26, %v6247_v48  ;;  %v4540_v11 = vpop.f32.mrf.mxu1 }
 0x3da   :  { %v3314_v32 = vsel %vm3285_vm1, %v3260_v49, -inf  ;;  %v3259_v5 = vmul.f32 %v6286_v14, %v3225_v54  ;;  %v3228_v55 = vmax.f32 %v3196_v34, 0.0  ;;  %v3159_v27 = vadd.f32 %v4540_v11, %v6250_v31 }
 0x3db   :  { %v3293_v7 = vrot.slane %v3292_v51, 1  ;;  %v3300_v10 = vrot.slane %v3299_v30, 2  ;;  %v3307_v25 = vrot.slane %v3306_v37, 4  ;;  %v3195_v2 = vadd.f32 %v6233_v36, %v3156_v3  ;;  %v3039_v24 = vpop.f32.mrf.mxu1 }
 0x3dc   :  { %v3313_v21 = vsel %vm3285_vm1, %v3259_v5, -inf  ;;  %v3262_v63 = vmul.f32 %v6268_v39, %v3228_v55  ;;  %v3198_v48 = vadd.f32 %v6233_v36, %v3159_v27  ;;  %v3158_v62 = vadd.f32 %v3039_v24, %v6254_v38 }
 0x3dd   :  { %v6358_v15 = vmax.f32 %v3292_v51, %v3293_v7  ;;  %v3301_v9 = vmax.f32 %v3299_v30, %v3300_v10  ;;  %v3308_v19 = vmax.f32 %v3306_v37, %v3307_v25  ;;  %v3315_v8 = vmax.f32 %v3313_v21, %v3314_v32  ;;  %v4543_v31 = vpop.f32.mrf.mxu1 }
 0x3de   :  { %v3323_v59 = vsel %vm3285_vm1, %v3262_v63, -inf  ;;  %v3227_v43 = vmax.f32 %v3195_v2, 0.0  ;;  %v3230_v60 = vmax.f32 %v3198_v48, 0.0  ;;  %v3197_v53 = vadd.f32 %v6233_v36, %v3158_v62 }
 0x3df   :  { %v3302_v28 = vrot.slane %v3301_v9, 1  ;;  %v3309_v42 = vrot.slane %v3308_v19, 2  ;;  %v3316_v4 = vrot.slane %v3315_v8, 4  ;;  %v3161_v61 = vadd.f32 %v4543_v31, %v6257_v12  ;;  %v3049_v52 = vpop.f32.mrf.mxu1 }
 0x3e0   :  { %v3261_v38 = vmul.f32 %v6286_v14, %v3227_v43  ;;  %v3264_v18 = vmul.f32 %v6268_v39, %v3230_v60  ;;  %v3229_v29 = vmax.f32 %v3197_v53, 0.0  ;;  %v3160_v16 = vadd.f32 %v3049_v52, %v6260_v22 }
 0x3e1   :  { %v6366_v26 = vmax.f32 %v3301_v9, %v3302_v28  ;;  %v3310_v33 = vmax.f32 %v3308_v19, %v3309_v42  ;;  %v3317_v49 = vmax.f32 %v3315_v8, %v3316_v4  ;;  %v3200_v54 = vadd.f32 %v6233_v36, %v3161_v61  ;;  %v4546_v34 = vpop.f32.mrf.mxu1 }
 0x3e2   :  { %v3322_v51 = vsel %vm3285_vm1, %v3261_v38, -inf  ;;  %v3332_v30 = vsel %vm3285_vm1, %v3264_v18, -inf  ;;  %v3263_v12 = vmul.f32 %v6286_v14, %v3229_v29  ;;  %v3199_v37 = vadd.f32 %v6233_v36, %v3160_v16 }
 0x3e3   :  { %v3311_v3 = vrot.slane %v3310_v33, 1  ;;  %v3318_v11 = vrot.slane %v3317_v49, 2  ;;  %v3324_v32 = vmax.f32 %v3322_v51, %v3323_v59  ;;  %v3232_v5 = vmax.f32 %v3200_v54, 0.0  ;;  %v3059_v22 = vpop.f32.mrf.mxu1 }
 0x3e4   :  { %v3331_v55 = vsel %vm3285_vm1, %v3263_v12, -inf  ;;  %v3231_v27 = vmax.f32 %v3199_v37, 0.0  ;;  %v3163_v7 = vadd.f32 %v4546_v34, %v6263_v46  ;;  %v3162_v10 = vadd.f32 %v3059_v22, %v6271_v23 }
 0x3e5   :  { %v6376_v25 = vmax.f32 %v3310_v33, %v3311_v3  ;;  %v3319_v2 = vmax.f32 %v3317_v49, %v3318_v11  ;;  %v3325_v24 = vrot.slane %v3324_v32, 4  ;;  %v3333_v21 = vmax.f32 %v3331_v55, %v3332_v30  ;;  %v4549_v63 = vpop.f32.mrf.mxu1 }
 0x3e6   :  { %v3266_v48 = vmul.f32 %v6268_v39, %v3232_v5  ;;  %v3265_v62 = vmul.f32 %v6286_v14, %v3231_v27  ;;  %v3202_v9 = vadd.f32 %v6233_v36, %v3163_v7  ;;  %v3201_v19 = vadd.f32 %v6233_v36, %v3162_v10 }
 0x3e7   :  { %v3320_v8 = vrot.slane %v3319_v2, 1  ;;  %v3326_v31 = vmax.f32 %v3324_v32, %v3325_v24  ;;  %v3334_v59 = vrot.slane %v3333_v21, 4  ;;  %v3165_v46 = vadd.f32 %v4549_v63, %v6275_v47  ;;  %v3069_v23 = vpop.f32.mrf.mxu1 }
 0x3e8   :  { %v3341_v43 = vsel %vm3285_vm1, %v3266_v48, -inf  ;;  %v3340_v60 = vsel %vm3285_vm1, %v3265_v62, -inf  ;;  %v3234_v53 = vmax.f32 %v3202_v9, 0.0  ;;  %v3233_v28 = vmax.f32 %v3201_v19, 0.0 }
 0x3e9   :  { %v6385_v42 = vmax.f32 %v3319_v2, %v3320_v8  ;;  %v3327_v4 = vrot.slane %v3326_v31, 2  ;;  %v3335_v61 = vmax.f32 %v3333_v21, %v3334_v59  ;;  %v3342_v52 = vmax.f32 %v3340_v60, %v3341_v43  ;;  %v4552_v38 = vpop.f32.mrf.mxu1 }
 0x3ea   :  { %v3268_v18 = vmul.f32 %v6268_v39, %v3234_v53  ;;  %v3267_v29 = vmul.f32 %v6286_v14, %v3233_v28  ;;  %v3204_v16 = vadd.f32 %v6233_v36, %v3165_v46  ;;  %v3164_v47 = vadd.f32 %v3069_v23, %v6278_v20 }
 0x3eb   :  { %v3328_v33 = vmax.f32 %v3326_v31, %v3327_v4  ;;  %v3336_v49 = vrot.slane %v3335_v61, 2  ;;  %v3343_v54 = vrot.slane %v3342_v52, 4  ;;  %v3167_v34 = vadd.f32 %v4552_v38, %v6281_v1  ;;  %v3079_v51 = vpop.f32.mrf.mxu1 }
 0x3ec   :  { %v3350_v30 = vsel %vm3285_vm1, %v3268_v18, -inf  ;;  %v3349_v12 = vsel %vm3285_vm1, %v3267_v29, -inf  ;;  %v3236_v37 = vmax.f32 %v3204_v16, 0.0  ;;  %v3203_v3 = vadd.f32 %v6233_v36, %v3164_v47 }
 0x3ed   :  { %v3329_v11 = vrot.slane %v3328_v33, 1  ;;  %v3337_v32 = vmax.f32 %v3335_v61, %v3336_v49  ;;  %v3344_v5 = vmax.f32 %v3342_v52, %v3343_v54  ;;  %v3351_v22 = vmax.f32 %v3349_v12, %v3350_v30  ;;  %v4555_v55 = vpop.f32.mrf.mxu1 }
 0x3ee   :  { %v3270_v20 = vmul.f32 %v6268_v39, %v3236_v37  ;;  %v3235_v27 = vmax.f32 %v3203_v3, 0.0  ;;  %v3206_v7 = vadd.f32 %v6233_v36, %v3167_v34  ;;  %v3166_v1 = vadd.f32 %v3079_v51, %v6291_v57 }
 0x3ef   :  { %v6398_v10 = vmax.f32 %v3328_v33, %v3329_v11  ;;  %v3338_v2 = vrot.slane %v3337_v32, 1  ;;  %v3345_v24 = vrot.slane %v3344_v5, 2  ;;  %v3352_v21 = vrot.slane %v3351_v22, 4  ;;  %v3089_v63 = vpop.f32.mrf.mxu1 }
 0x3f0   :  { %v3359_v48 = vsel %vm3285_vm1, %v3270_v20, -inf  ;;  %v3269_v62 = vmul.f32 %v6286_v14, %v3235_v27  ;;  %v3238_v9 = vmax.f32 %v3206_v7, 0.0  ;;  %v3205_v19 = vadd.f32 %v6233_v36, %v3166_v1 }
 0x3f1   :  { %v6403_v8 = vmax.f32 %v3344_v5, %v3345_v24  ;;  %v6405_v31 = vmax.f32 %v3351_v22, %v3352_v21  ;;  %v3169_v59 = vadd.f32 %v4555_v55, %v6294_v58  ;;  %v3168_v57 = vadd.f32 %v3089_v63, %v6297_v35  ;;  %v4558_v46 = vpop.f32.mrf.mxu1 }
 0x3f2   :  { %v3358_v23 = vsel %vm3285_vm1, %v3269_v62, -inf  ;;  %v3272_v43 = vmul.f32 %v6268_v39, %v3238_v9  ;;  %v3237_v60 = vmax.f32 %v3205_v19, 0.0  ;;  %v3171_v53 = vadd.f32 %v4558_v46, %v6300_v6 }
 0x3f3   :  { %v3360_v28 = vmax.f32 %v3358_v23, %v3359_v48  ;;  %v3208_v4 = vadd.f32 %v6233_v36, %v3169_v59  ;;  %v3207_v61 = vadd.f32 %v6233_v36, %v3168_v57  ;;  %v3099_v52 = vpop.f32.mrf.mxu1  ;;  %v6414_v38 = vmax.f32 %v3337_v32, %v3338_v2 }
 0x3f4   :  { %v3368_v58 = vsel %vm3285_vm1, %v3272_v43, -inf  ;;  %v3271_v35 = vmul.f32 %v6286_v14, %v3237_v60  ;;  %v3210_v18 = vadd.f32 %v6233_v36, %v3171_v53  ;;  %v3170_v29 = vadd.f32 %v3099_v52, %v6303_v56 }
 0x3f5   :  { %v3361_v16 = vrot.slane %v3360_v28, 4  ;;  %v3240_v47 = vmax.f32 %v3208_v4, 0.0  ;;  %v3239_v33 = vmax.f32 %v3207_v61, 0.0  ;;  %v4561_v6 = vpop.f32.mrf.mxu1  ;;  %v3347_v49 = vrot.slane %v6403_v8, 1 }
 0x3f6   :  { %v3367_v54 = vsel %vm3285_vm1, %v3271_v35, -inf  ;;  %v3242_v34 = vmax.f32 %v3210_v18, 0.0  ;;  %v3209_v51 = vadd.f32 %v6233_v36, %v3170_v29  ;;  %v3173_v30 = vadd.f32 %v4561_v6, %v6308_v41 }
 0x3f7   :  { %v3362_v12 = vmax.f32 %v3360_v28, %v3361_v16  ;;  %v3369_v37 = vmax.f32 %v3367_v54, %v3368_v58  ;;  %v3274_v3 = vmul.f32 %v6268_v39, %v3240_v47  ;;  %v3273_v11 = vmul.f32 %v6286_v14, %v3239_v33  ;;  %v3109_v56 = vpop.f32.mrf.mxu1 }
 0x3f8   :  { %v3276_v32 = vmul.f32 %v6268_v39, %v3242_v34  ;;  %v3241_v5 = vmax.f32 %v3209_v51, 0.0  ;;  %v3212_v22 = vadd.f32 %v6233_v36, %v3173_v30  ;;  %v3172_v55 = vadd.f32 %v3109_v56, %v6311_v0 }
 0x3f9   :  { %v3363_v20 = vrot.slane %v3362_v12, 2  ;;  %v3370_v27 = vrot.slane %v3369_v37, 4  ;;  %v3377_v7 = vsel %vm3285_vm1, %v3274_v3, -inf  ;;  %v3376_v41 = vsel %vm3285_vm1, %v3273_v11, -inf  ;;  %v4564_v1 = vpop.f32.mrf.mxu1 }
 0x3fa   :  { %v3378_v2 = vmax.f32 %v3376_v41, %v3377_v7  ;;  %v3386_v24 = vsel %vm3285_vm1, %v3276_v32, -inf  ;;  %v3275_v21 = vmul.f32 %v6286_v14, %v3241_v5  ;;  %v3244_v63 = vmax.f32 %v3212_v22, 0.0 }
 0x3fb   :  { %v3364_v48 = vmax.f32 %v3362_v12, %v3363_v20  ;;  %v3371_v62 = vmax.f32 %v3369_v37, %v3370_v27  ;;  %v3211_v9 = vadd.f32 %v6233_v36, %v3172_v55  ;;  %v3175_v19 = vadd.f32 %v4564_v1, %v6317_v17  ;;  %v3119_v0 = vpop.f32.mrf.mxu1 }
 0x3fc   :  { %v3379_v59 = vrot.slane %v3378_v2, 4  ;;  %v3385_v57 = vsel %vm3285_vm1, %v3275_v21, -inf  ;;  %v3278_v46 = vmul.f32 %v6268_v39, %v3244_v63  ;;  %v3174_v23 = vadd.f32 %v3119_v0, %v6320_v13 }
 0x3fd   :  { %v3365_v43 = vrot.slane %v3364_v48, 1  ;;  %v3372_v60 = vrot.slane %v3371_v62, 2  ;;  %v3387_v53 = vmax.f32 %v3385_v57, %v3386_v24  ;;  %v3243_v28 = vmax.f32 %v3211_v9, 0.0  ;;  %v4567_v4 = vpop.f32.mrf.mxu1 }
 0x3fe   :  { %v3380_v61 = vmax.f32 %v3378_v2, %v3379_v59  ;;  %v3395_v52 = vsel %vm3285_vm1, %v3278_v46, -inf  ;;  %v3214_v17 = vadd.f32 %v6233_v36, %v3175_v19  ;;  %v3213_v58 = vadd.f32 %v6233_v36, %v3174_v23 }
 0x3ff   :  { %v3366_v35 = vmax.f32 %v3364_v48, %v3365_v43  ;;  %v3373_v18 = vmax.f32 %v3371_v62, %v3372_v60  ;;  %v3388_v29 = vrot.slane %v3387_v53, 4  ;;  %v3277_v13 = vmul.f32 %v6286_v14, %v3243_v28  ;;  %v3129_v12 = vpop.f32.mrf.mxu1 }
 0x400   :  { %v3381_v16 = vrot.slane %v3380_v61, 2  ;;  %v3246_v47 = vmax.f32 %v3214_v17, 0.0  ;;  %v3245_v33 = vmax.f32 %v3213_v58, 0.0  ;;  %v3348_v6 = vmax.f32 %v6403_v8, %v3347_v49 }
 0x401   :  { %v3374_v54 = vrot.slane %v3373_v18, 1  ;;  %v3389_v34 = vmax.f32 %v3387_v53, %v3388_v29  ;;  %v3394_v51 = vsel %vm3285_vm1, %v3277_v13, -inf  ;;  %v3354_v30 = vrot.slane %v6405_v31, 2  ;;  %v4570_v24 = vpop.f32.mrf.mxu1 }
 0x402   :  { %v3382_v37 = vmax.f32 %v3380_v61, %v3381_v16  ;;  %v3396_v3 = vmax.f32 %v3394_v51, %v3395_v52  ;;  %v3280_v11 = vmul.f32 %v6268_v39, %v3246_v47  ;;  %v3279_v56 = vmul.f32 %v6286_v14, %v3245_v33 }
 0x403   :  { %v3375_v32 = vmax.f32 %v3373_v18, %v3374_v54  ;;  %v3390_v5 = vrot.slane %v3389_v34, 2  ;;  %v3355_v22 = vmax.f32 %v6405_v31, %v3354_v30  ;;  %v3460_v8 = vsel %vm3459_vm8, %v6366_v26, %v6358_v15  ;;  %v3139_v43 = vpop.f32.mrf.mxu1 }
 0x404   :  { %v3383_v49 = vrot.slane %v3382_v37, 1  ;;  %v3397_v55 = vrot.slane %v3396_v3, 4  ;;  %v3404_v20 = vsel %vm3285_vm1, %v3280_v11, -inf  ;;  %v3403_v27 = vsel %vm3285_vm1, %v3279_v56, -inf }
 0x405   :  { %v3473_v7 = vsel %vm3459_vm8, %v3375_v32, %v3366_v35  ;;  %v3391_v41 = vmax.f32 %v3389_v34, %v3390_v5  ;;  %v3405_v1 = vmax.f32 %v3403_v27, %v3404_v20  ;;  %v3356_v2 = vrot.slane %v3355_v22, 1 }
 0x406   :  { %v3384_v21 = vmax.f32 %v3382_v37, %v3383_v49  ;;  %v3398_v63 = vmax.f32 %v3396_v3, %v3397_v55  ;;  %v3462_v31 = vsel %vm3461_vm9, %v6376_v25, %v3460_v8  ;;  %v3177_v48 = vadd.f32 %v4567_v4, %v6324_v44 }
 0x407   :  { %v3392_v15 = vrot.slane %v3391_v41, 1  ;;  %v3406_v26 = vrot.slane %v3405_v1, 4  ;;  %v3357_v62 = vmax.f32 %v3355_v22, %v3356_v2  ;;  %v3464_v9 = vsel %vm3463_vm10, %v6385_v42, %v3462_v31  ;;  %v4013_v2 = vld [vmem:[%s6516_s6] ss:$0 sm:$0xff] }
 0x408   :  { %v3399_v19 = vrot.slane %v3398_v63, 2  ;;  %v3466_v0 = vsel %vm3465_vm11, %v6398_v10, %v3464_v9  ;;  %v3474_v59 = vsel %vm3461_vm9, %v3384_v21, %v3473_v7  ;;  %v3216_v57 = vadd.f32 %v6233_v36, %v3177_v48 }
 0x409   :  { %v3393_v46 = vmax.f32 %v3391_v41, %v3392_v15  ;;  %v3407_v23 = vmax.f32 %v3405_v1, %v3406_v26  ;;  %v3468_v25 = vsel %vm3467_vm12, %v6414_v38, %v3466_v0  ;;  %v3176_v44 = vadd.f32 %v3129_v12, %v6329_v45  ;;  %v3576_v0 = vld [vmem:[%s6517_s7 + $0x8] sm:$0xff] }
 0x40a   :  { %v3400_v60 = vmax.f32 %v3398_v63, %v3399_v19  ;;  %v3470_v53 = vsel %vm3469_vm13, %v3348_v6, %v3468_v25  ;;  %v3248_v42 = vmax.f32 %v3216_v57, 0.0  ;;  %v3179_v28 = vadd.f32 %v4570_v24, %v6336_v50  ;;  %4586 = vmatprep.subr.mxu0 %v3576_v0 }
 0x40b   :  { %v3408_v4 = vrot.slane %v3407_v23, 2  ;;  %v3472_v10 = vsel %vm3471_vm14, %v3357_v62, %v3470_v53  ;;  %v3475_v61 = vsel %vm3463_vm10, %v3393_v46, %v3474_v59  ;;  %v3215_v52 = vadd.f32 %v6233_v36, %v3176_v44  ;;  %v3575_v59 = vld [vmem:[%s6517_s7] sm:$0xff] }
 0x40c   :  { %v3401_v17 = vrot.slane %v3400_v60, 1  ;;  %4583 = vmatprep.mubr.msk.f32.mxu0 %vm3285_vm1, %v3472_v10  ;;  %v3218_v38 = vadd.f32 %v6233_v36, %v3179_v28  ;;  %v3178_v45 = vadd.f32 %v3139_v43, %v6343_v40  ;;  %v3282_v35 = vmul.f32 %v6268_v39, %v3248_v42  ;;  %v4016_v42 = vld [vmem:[%s6518_s8] ss:$0 sm:$0xff] }
 0x40d   :  { %v3409_v58 = vmax.f32 %v3407_v23, %v3408_v4  ;;  %v3247_v18 = vmax.f32 %v3215_v52, 0.0 }
 0x40e   :  { %v3402_v29 = vmax.f32 %v3400_v60, %v3401_v17  ;;  %v3250_v50 = vmax.f32 %v3218_v38, 0.0  ;;  %v3217_v13 = vadd.f32 %v6233_v36, %v3178_v45  ;;  %v3413_v51 = vsel %vm3285_vm1, %v3282_v35, -inf }
 0x40f   :  { %v3410_v16 = vrot.slane %v3409_v58, 1  ;;  %v3281_v47 = vmul.f32 %v6286_v14, %v3247_v18 }
 0x410   :  { %v3476_v33 = vsel %vm3465_vm11, %v3402_v29, %v3475_v61  ;;  %v3284_v6 = vmul.f32 %v6268_v39, %v3250_v50  ;;  %v3249_v54 = vmax.f32 %v3217_v13, 0.0 }
 0x411   :  { %v3411_v34 = vmax.f32 %v3409_v58, %v3410_v16  ;;  %v3412_v40 = vsel %vm3285_vm1, %v3281_v47, -inf }
 0x412   :  { %v3414_v30 = vmax.f32 %v3412_v40, %v3413_v51  ;;  %v3283_v12 = vmul.f32 %v6286_v14, %v3249_v54  ;;  %v3422_v36 = vsel %vm3285_vm1, %v3284_v6, -inf }
 0x413   :  { %v3477_v37 = vsel %vm3467_vm12, %v3411_v34, %v3476_v33 }
 0x414   :  { %v3415_v3 = vrot.slane %v3414_v30, 4  ;;  %v3421_v11 = vsel %vm3285_vm1, %v3283_v12, -inf }
 0x415   :  { %v3423_v56 = vmax.f32 %v3421_v11, %v3422_v36 }
 0x416   :  { %v3416_v32 = vmax.f32 %v3414_v30, %v3415_v3 }
 0x417   :  { %v3424_v5 = vrot.slane %v3423_v56, 4 }
 0x418   :  { %v3417_v39 = vrot.slane %v3416_v32, 2 }
 0x419   :  { %v3425_v22 = vmax.f32 %v3423_v56, %v3424_v5 }
 0x41a   :  { %v3418_v8 = vmax.f32 %v3416_v32, %v3417_v39 }
 0x41b   :  { %v3426_v49 = vrot.slane %v3425_v22, 2 }
 0x41c   :  { %v3419_v55 = vrot.slane %v3418_v8, 1 }
 0x41d   :  { %v3427_v20 = vmax.f32 %v3425_v22, %v3426_v49 }
 0x41e   :  { %v3420_v27 = vmax.f32 %v3418_v8, %v3419_v55 }
 0x41f   :  { %v3428_v7 = vrot.slane %v3427_v20, 1 }
 0x420   :  { %v3478_v14 = vsel %vm3469_vm13, %v3420_v27, %v3477_v37 }
 0x421   :  { %v3429_v41 = vmax.f32 %v3427_v20, %v3428_v7 }
 0x423   :  { %v3479_v1 = vsel %vm3471_vm14, %v3429_v41, %v3478_v14 }
 0x424   :  { %4584 = vmatmul.mubr.msk.f32.vlgmr.msra.gmra.mxu0 %vm3285_vm1, %v3479_v1 }
 0x425   :  { %4587 = vmatpush3.msra.mxu0 %v3576_v0 }
 0x426   :  { %4588 = vmatprep.subr.mxu0 %v3575_v59 }
 0x427   :  { %4589 = vmatpush3.msra.mxu0 %v3575_v59 }
 0x4e4   :  { %v4585_v24 = vpop.f32.mrf.mxu0 }
 0x4e5   :  { %v3556_v21 = vadd.f32 %v4585_v24, %v4013_v2 }
 0x4e6   :  { %v3550_v63 = vpop.f32.mrf.mxu0 }
 0x4e7   :  { %v3560_v31 = vmax.f32 %v3556_v21, 0.0  ;;  %v3551_v48 = vadd.f32 %v4013_v2, %v3550_v63 }
 0x4e9   :  { %v3562_v15 = vmul.f32 %v3560_v31, %v3560_v31  ;;  %v3559_v26 = vmax.f32 %v3551_v48, 0.0 }
 0x4eb   :  { %v3561_v62 = vmul.f32 %v3559_v26, %v3559_v26  ;;  %v3566_v9 = vsel %vm72_vm0, %v3562_v15, 0.0 }
 0x4ec   :  { %3567 = vadd.xlane.f32.xlu1 %v3566_v9 }
 0x4ed   :  { %v3563_v19 = vsel %vm72_vm0, %v3561_v62, 0.0 }
 0x4ee   :  { %3564 = vadd.xlane.f32.xlu0 %v3563_v19 }
 0x575   :  { %v3568_v57 = vpop.xlane.xlu1 %3567 }
 0x576   :  { %v3570_v46 = vmax.f32 %v3568_v57, 1e-24 }
 0x577   :  { %v3565_v23 = vpop.xlane.xlu0 %3564 }
 0x578   :  { %v3569_v25 = vmax.f32 %v3565_v23, 1e-24  ;;  %4647 = vrsqrt.f32 %v3570_v46 }
 0x57a   :  { %4649 = vrsqrt.f32 %v3569_v25 }
 0x585   :  { %v4648_v44 = vpop.eup %4647 }
 0x586   :  { %v3574_v53 = vmul.f32 %v4648_v44, %v3560_v31 }
 0x587   :  { %v4650_v43 = vpop.eup %4649 }
 0x588   :  { %v3573_v60 = vmul.f32 %v4650_v43, %v3559_v26 }
 0x58a   :  { %4590 = vmatprep.mubr.msk.f32.mxu0 %vm72_vm0, %v3573_v60 }
 0x58b   :  { %4591 = vmatmul.mubr.msk.f32.vlgmr.msra.gmra.mxu0 %vm72_vm0, %v3574_v53 }
 0x64b   :  { %v4592_v28 = vpop.f32.mrf.mxu0 }
 0x64c   :  { %v3662_v4 = vadd.f32 %v4592_v28, %v4016_v42 }
 0x64d   :  { %v3656_v10 = vpop.f32.mrf.mxu0 }
 0x64e   :  { %3667 = vst.msk [vmem:[%s6519_s9 + $0x8] sm:$0xff] %vm3665_vm15, %v3662_v4  ;;  %v3657_v61 = vadd.f32 %v4016_v42, %v3656_v10 }
 0x650   :  { %3666 = vst.msk [vmem:[%s6519_s9] sm:$0xff] %vm3665_vm15, %v3657_v61 }

</bundles_post_ra>
